<compile_context>
chip_gen: v6e
topology: v6e:2x2x1
jax: 0.10.0
libtpu: 0.0.40
codegen_flags: <defaults>
</compile_context>

<pallas_src>
import jax
import jax.numpy as jnp
from jax.experimental import pallas as pl
from jax.experimental.pallas import tpu as pltpu


def _make_dwconv_kernel(k, H, W, p, Nblk, Cblk, channelwise):
    """Kernel body for a kxk depthwise conv on an (Nblk, H, W, Cblk) tile."""
    Hp, Wp = H + 2 * p, W + 2 * p
    Ho, Wo = Hp - k + 1, Wp - k + 1

    def kernel(w_ref, x_ref, o_ref, *scratch):
        # w_ref : (k, k) in SMEM (channelwise) | (k, k, Cblk) in VMEM (per-channel)
        # x_ref : (Nblk, H,  W,  Cblk)   channels on the 128-lane axis
        # o_ref : (Nblk, Ho, Wo, Cblk)
        if p > 0:
            xpad_ref = scratch[0]                         # (Nblk, Hp, Wp, Cblk) VMEM
            xpad_ref[...] = jnp.zeros_like(xpad_ref)      # zero halo once per step
            xpad_ref[:, p:p + H, p:p + W, :] = x_ref[...] # in-VMEM padding (no HBM pad)
            src = xpad_ref
        else:
            src = x_ref

        acc = jnp.zeros((Nblk, Ho, Wo, Cblk), jnp.float32)
        # Unrolled k*k taps: cross-correlation order, matches torch F.conv2d.
        # Taps are sublane/row offsets only; f32 accumulate on the VPU.
        # (For bf16 activations on v6e/v7x one could multiply in bf16 and only
        #  accumulate in f32 to halve bytes; kept f32 here for exact semantics.)
        for di in range(k):
            for dj in range(k):
                tap = src[:, di:di + Ho, dj:dj + Wo, :].astype(jnp.float32)
                if channelwise:
                    wv = w_ref[di, dj].astype(jnp.float32)      # scalar from SMEM
                else:
                    wv = w_ref[di, dj, :].astype(jnp.float32)   # (Cblk,) lane vector
                acc = acc + wv * tap
        o_ref[...] = acc.astype(o_ref.dtype)

    return kernel


def channelwise_conv2d(x, kernel, kernel_size, padding=0, channelwise=True):
    """Pallas TPU equivalent of ChannelWiseConv2d.forward.

    x      : (N, C, H, W)   (NCHW, like the PyTorch module)
    kernel : (1, 1, k, k) if channelwise else (C, 1, k, k)
    returns: (N, C, Ho, Wo)
    """
    N, C, H, W = x.shape
    k = int(kernel_size)
    p = int(padding)
    Hp, Wp = H + 2 * p, W + 2 * p
    Ho, Wo = Hp - k + 1, Wp - k + 1

    # Channels-last relayout so C sits on the lane axis.  (In a channels-last
    # pipeline these transposes disappear.)
    x_nhwc = jnp.transpose(x, (0, 2, 3, 1))

    # Channel block: lane-dense 128 when possible, otherwise the full C dim.
    Cblk = 128 if (C % 128 == 0) else C

    # Fuse batch planes per grid step; keep the per-step working set
    # (2x in + 2x out double-buffers + padded scratch) comfortably under VMEM.
    itemsize = jnp.dtype(x.dtype).itemsize
    per_n_bytes = (2 * H * W + 2 * Ho * Wo + Hp * Wp) * Cblk * itemsize
    budget = 8 * 1024 * 1024
    Nblk = 1
    for d in range(1, min(N, 8) + 1):
        if N % d == 0 and d * per_n_bytes <= budget:
            Nblk = d

    grid = (N // Nblk, C // Cblk)

    if channelwise:
        # Single shared (k, k) filter -> SMEM, read as scalars in the kernel.
        w = kernel.reshape(k, k).astype(jnp.float32)
        w_spec = pl.BlockSpec(memory_space=pltpu.MemorySpace.SMEM)
    else:
        # Per-channel filters, channels-last so the multiply is lane-aligned.
        w = jnp.transpose(kernel.reshape(C, k, k), (1, 2, 0))   # (k, k, C)
        w_spec = pl.BlockSpec((k, k, Cblk), lambda nb, cb: (0, 0, cb))

    in_specs = [
        w_spec,
        pl.BlockSpec((Nblk, H, W, Cblk), lambda nb, cb: (nb, 0, 0, cb)),
    ]
    out_spec = pl.BlockSpec((Nblk, Ho, Wo, Cblk), lambda nb, cb: (nb, 0, 0, cb))
    scratch_shapes = ([pltpu.VMEM((Nblk, Hp, Wp, Cblk), x.dtype)] if p > 0 else [])

    out_nhwc = pl.pallas_call(
        _make_dwconv_kernel(k, H, W, p, Nblk, Cblk, channelwise),
        out_shape=jax.ShapeDtypeStruct((N, Ho, Wo, C), x.dtype),
        grid_spec=pltpu.PrefetchScalarGridSpec(
            num_scalar_prefetch=0,
            grid=grid,
            in_specs=in_specs,
            out_specs=out_spec,
            scratch_shapes=scratch_shapes,
        ),
        compiler_params=pltpu.CompilerParams(
            dimension_semantics=("parallel", "parallel"),
            vmem_limit_bytes=32 * 1024 * 1024,
        ),
    )(w, x_nhwc)

    # Back to NCHW to match torch.nn.functional.conv2d output layout.
    return jnp.transpose(out_nhwc, (0, 3, 1, 2))


def _reference(x, kernel, kernel_size, padding, channelwise):
    """Pure-JAX reference (lax depthwise conv) for validation."""
    N, C, H, W = x.shape
    k = kernel_size
    if channelwise:
        w = jnp.broadcast_to(kernel, (C, 1, k, k))
    else:
        w = kernel
    return jax.lax.conv_general_dilated(
        x, w,
        window_strides=(1, 1),
        padding=[(padding, padding), (padding, padding)],
        dimension_numbers=("NCHW", "OIHW", "NCHW"),
        feature_group_count=C,
    )


if __name__ == "__main__":
    key = jax.random.PRNGKey(0)
    k1, k2, k3, k4 = jax.random.split(key, 4)

    # Test 1: lane-dense channelwise path (shared 3x3 kernel, C = 128).
    N, C, H, W = 2, 128, 16, 16
    kernel_size, padding = 3, 1
    x1 = jax.random.normal(k1, (N, C, H, W), dtype=jnp.float32)
    kern1 = jax.random.normal(k2, (1, 1, kernel_size, kernel_size), dtype=jnp.float32)
    out1 = channelwise_conv2d(x1, kern1, kernel_size, padding, channelwise=True)
    out1 = jax.block_until_ready(out1)
    ref1 = _reference(x1, kern1, kernel_size, padding, True)
    assert out1.shape == ref1.shape, (out1.shape, ref1.shape)
    assert jnp.allclose(out1, ref1, atol=1e-4, rtol=1e-4), "mismatch (channelwise=True)"

    # Test 2: per-channel filters, small C (Cblk falls back to full C).
    N2, C2 = 2, 4
    x2 = jax.random.normal(k3, (N2, C2, H, W), dtype=jnp.float32)
    kern2 = jax.random.normal(k4, (C2, 1, kernel_size, kernel_size), dtype=jnp.float32)
    out2 = channelwise_conv2d(x2, kern2, kernel_size, padding, channelwise=False)
    out2 = jax.block_until_ready(out2)
    ref2 = _reference(x2, kern2, kernel_size, padding, False)
    assert out2.shape == ref2.shape, (out2.shape, ref2.shape)
    assert jnp.allclose(out2, ref2, atol=1e-4, rtol=1e-4), "mismatch (channelwise=False)"

    print("KERNEL_OK")
</pallas_src>

<mosaic_0001>
module attributes {stable_mosaic.version = 11 : i64} {
  func.func @kernel(%arg0: i32, %arg1: i32, %arg2: memref<3x3xf32, #tpu.memory_space<smem>>, %arg3: memref<2x16x16x128xf32, #tpu.memory_space<vmem>>, %arg4: memref<2x16x16x128xf32, #tpu.memory_space<vmem>>, %arg5: memref<2x18x18x128xf32, #tpu.memory_space<vmem>>) attributes {dimension_semantics = [#tpu.dimension_semantics<parallel>, #tpu.dimension_semantics<parallel>], iteration_bounds = array<i64: 1, 1>, scalar_prefetch = 0 : i64, scratch_operands = 1 : i64, tpu.core_type = #tpu.core_type<tc>, window_params = [{transform_indices = @transform_0, window_bounds = array<i64: 3, 3>}, {transform_indices = @transform_1, window_bounds = array<i64: 2, 16, 16, 128>}, {transform_indices = @transform_2, window_bounds = array<i64: 2, 16, 16, 128>}]} {
    %cst = arith.constant 0.000000e+00 : f32
    %0 = vector.broadcast %cst : f32 to vector<2x18x18x128xf32>
    %c0 = arith.constant 0 : index
    %c0_0 = arith.constant 0 : index
    %c0_1 = arith.constant 0 : index
    %c0_2 = arith.constant 0 : index
    %1 = vector.load %arg5[%c0, %c0_0, %c0_1, %c0_2] : memref<2x18x18x128xf32, #tpu.memory_space<vmem>>, vector<2x18x18x128xf32>
    tpu.vector_store %arg5[%c0, %c0_0, %c0_1, %c0_2], %0 {strides = array<i32>} : memref<2x18x18x128xf32, #tpu.memory_space<vmem>>, vector<2x18x18x128xf32>,
    %c0_3 = arith.constant 0 : index
    %c0_4 = arith.constant 0 : index
    %c0_5 = arith.constant 0 : index
    %c0_6 = arith.constant 0 : index
    %2 = vector.load %arg3[%c0_3, %c0_4, %c0_5, %c0_6] : memref<2x16x16x128xf32, #tpu.memory_space<vmem>>, vector<2x16x16x128xf32>
    %c0_7 = arith.constant 0 : index
    %c1 = arith.constant 1 : index
    %c1_8 = arith.constant 1 : index
    %c0_9 = arith.constant 0 : index
    %3 = vector.load %arg5[%c0_7, %c1, %c1_8, %c0_9] : memref<2x18x18x128xf32, #tpu.memory_space<vmem>>, vector<2x16x16x128xf32>
    tpu.vector_store %arg5[%c0_7, %c1, %c1_8, %c0_9], %2 {strides = array<i32>} : memref<2x18x18x128xf32, #tpu.memory_space<vmem>>, vector<2x16x16x128xf32>,
    %cst_10 = arith.constant 0.000000e+00 : f32
    %4 = vector.broadcast %cst_10 : f32 to vector<2x16x16x128xf32>
    %c0_11 = arith.constant 0 : index
    %c0_12 = arith.constant 0 : index
    %c0_13 = arith.constant 0 : index
    %c0_14 = arith.constant 0 : index
    %5 = vector.load %arg5[%c0_11, %c0_12, %c0_13, %c0_14] : memref<2x18x18x128xf32, #tpu.memory_space<vmem>>, vector<2x16x16x128xf32>
    %c0_15 = arith.constant 0 : index
    %c0_16 = arith.constant 0 : index
    %6 = memref.load %arg2[%c0_15, %c0_16] : memref<3x3xf32, #tpu.memory_space<smem>>
    %7 = vector.broadcast %6 : f32 to vector<2x16x16x128xf32>
    %8 = arith.mulf %7, %5 : vector<2x16x16x128xf32>
    %9 = arith.addf %4, %8 : vector<2x16x16x128xf32>
    %c0_17 = arith.constant 0 : index
    %c0_18 = arith.constant 0 : index
    %c1_19 = arith.constant 1 : index
    %c0_20 = arith.constant 0 : index
    %10 = vector.load %arg5[%c0_17, %c0_18, %c1_19, %c0_20] : memref<2x18x18x128xf32, #tpu.memory_space<vmem>>, vector<2x16x16x128xf32>
    %c0_21 = arith.constant 0 : index
    %c1_22 = arith.constant 1 : index
    %11 = memref.load %arg2[%c0_21, %c1_22] : memref<3x3xf32, #tpu.memory_space<smem>>
    %12 = vector.broadcast %11 : f32 to vector<2x16x16x128xf32>
    %13 = arith.mulf %12, %10 : vector<2x16x16x128xf32>
    %14 = arith.addf %9, %13 : vector<2x16x16x128xf32>
    %c0_23 = arith.constant 0 : index
    %c0_24 = arith.constant 0 : index
    %c2 = arith.constant 2 : index
    %c0_25 = arith.constant 0 : index
    %15 = vector.load %arg5[%c0_23, %c0_24, %c2, %c0_25] : memref<2x18x18x128xf32, #tpu.memory_space<vmem>>, vector<2x16x16x128xf32>
    %c0_26 = arith.constant 0 : index
    %c2_27 = arith.constant 2 : index
    %16 = memref.load %arg2[%c0_26, %c2_27] : memref<3x3xf32, #tpu.memory_space<smem>>
    %17 = vector.broadcast %16 : f32 to vector<2x16x16x128xf32>
    %18 = arith.mulf %17, %15 : vector<2x16x16x128xf32>
    %19 = arith.addf %14, %18 : vector<2x16x16x128xf32>
    %c0_28 = arith.constant 0 : index
    %c1_29 = arith.constant 1 : index
    %c0_30 = arith.constant 0 : index
    %c0_31 = arith.constant 0 : index
    %20 = vector.load %arg5[%c0_28, %c1_29, %c0_30, %c0_31] : memref<2x18x18x128xf32, #tpu.memory_space<vmem>>, vector<2x16x16x128xf32>
    %c1_32 = arith.constant 1 : index
    %c0_33 = arith.constant 0 : index
    %21 = memref.load %arg2[%c1_32, %c0_33] : memref<3x3xf32, #tpu.memory_space<smem>>
    %22 = vector.broadcast %21 : f32 to vector<2x16x16x128xf32>
    %23 = arith.mulf %22, %20 : vector<2x16x16x128xf32>
    %24 = arith.addf %19, %23 : vector<2x16x16x128xf32>
    %c0_34 = arith.constant 0 : index
    %c1_35 = arith.constant 1 : index
    %c1_36 = arith.constant 1 : index
    %c0_37 = arith.constant 0 : index
    %25 = vector.load %arg5[%c0_34, %c1_35, %c1_36, %c0_37] : memref<2x18x18x128xf32, #tpu.memory_space<vmem>>, vector<2x16x16x128xf32>
    %c1_38 = arith.constant 1 : index
    %c1_39 = arith.constant 1 : index
    %26 = memref.load %arg2[%c1_38, %c1_39] : memref<3x3xf32, #tpu.memory_space<smem>>
    %27 = vector.broadcast %26 : f32 to vector<2x16x16x128xf32>
    %28 = arith.mulf %27, %25 : vector<2x16x16x128xf32>
    %29 = arith.addf %24, %28 : vector<2x16x16x128xf32>
    %c0_40 = arith.constant 0 : index
    %c1_41 = arith.constant 1 : index
    %c2_42 = arith.constant 2 : index
    %c0_43 = arith.constant 0 : index
    %30 = vector.load %arg5[%c0_40, %c1_41, %c2_42, %c0_43] : memref<2x18x18x128xf32, #tpu.memory_space<vmem>>, vector<2x16x16x128xf32>
    %c1_44 = arith.constant 1 : index
    %c2_45 = arith.constant 2 : index
    %31 = memref.load %arg2[%c1_44, %c2_45] : memref<3x3xf32, #tpu.memory_space<smem>>
    %32 = vector.broadcast %31 : f32 to vector<2x16x16x128xf32>
    %33 = arith.mulf %32, %30 : vector<2x16x16x128xf32>
    %34 = arith.addf %29, %33 : vector<2x16x16x128xf32>
    %c0_46 = arith.constant 0 : index
    %c2_47 = arith.constant 2 : index
    %c0_48 = arith.constant 0 : index
    %c0_49 = arith.constant 0 : index
    %35 = vector.load %arg5[%c0_46, %c2_47, %c0_48, %c0_49] : memref<2x18x18x128xf32, #tpu.memory_space<vmem>>, vector<2x16x16x128xf32>
    %c2_50 = arith.constant 2 : index
    %c0_51 = arith.constant 0 : index
    %36 = memref.load %arg2[%c2_50, %c0_51] : memref<3x3xf32, #tpu.memory_space<smem>>
    %37 = vector.broadcast %36 : f32 to vector<2x16x16x128xf32>
    %38 = arith.mulf %37, %35 : vector<2x16x16x128xf32>
    %39 = arith.addf %34, %38 : vector<2x16x16x128xf32>
    %c0_52 = arith.constant 0 : index
    %c2_53 = arith.constant 2 : index
    %c1_54 = arith.constant 1 : index
    %c0_55 = arith.constant 0 : index
    %40 = vector.load %arg5[%c0_52, %c2_53, %c1_54, %c0_55] : memref<2x18x18x128xf32, #tpu.memory_space<vmem>>, vector<2x16x16x128xf32>
    %c2_56 = arith.constant 2 : index
    %c1_57 = arith.constant 1 : index
    %41 = memref.load %arg2[%c2_56, %c1_57] : memref<3x3xf32, #tpu.memory_space<smem>>
    %42 = vector.broadcast %41 : f32 to vector<2x16x16x128xf32>
    %43 = arith.mulf %42, %40 : vector<2x16x16x128xf32>
    %44 = arith.addf %39, %43 : vector<2x16x16x128xf32>
    %c0_58 = arith.constant 0 : index
    %c2_59 = arith.constant 2 : index
    %c2_60 = arith.constant 2 : index
    %c0_61 = arith.constant 0 : index
    %45 = vector.load %arg5[%c0_58, %c2_59, %c2_60, %c0_61] : memref<2x18x18x128xf32, #tpu.memory_space<vmem>>, vector<2x16x16x128xf32>
    %c2_62 = arith.constant 2 : index
    %c2_63 = arith.constant 2 : index
    %46 = memref.load %arg2[%c2_62, %c2_63] : memref<3x3xf32, #tpu.memory_space<smem>>
    %47 = vector.broadcast %46 : f32 to vector<2x16x16x128xf32>
    %48 = arith.mulf %47, %45 : vector<2x16x16x128xf32>
    %49 = arith.addf %44, %48 : vector<2x16x16x128xf32>
    %c0_64 = arith.constant 0 : index
    %c0_65 = arith.constant 0 : index
    %c0_66 = arith.constant 0 : index
    %c0_67 = arith.constant 0 : index
    %50 = vector.load %arg4[%c0_64, %c0_65, %c0_66, %c0_67] : memref<2x16x16x128xf32, #tpu.memory_space<vmem>>, vector<2x16x16x128xf32>
    tpu.vector_store %arg4[%c0_64, %c0_65, %c0_66, %c0_67], %49 {strides = array<i32>} : memref<2x16x16x128xf32, #tpu.memory_space<vmem>>, vector<2x16x16x128xf32>,
    return
  }
  func.func @transform_0(%arg0: i32, %arg1: i32) -> (i32, i32) {
    %c0_i32 = arith.constant 0 : i32
    %c0_i32_0 = arith.constant 0 : i32
    %c0_i32_1 = arith.constant 0 : i32
    return %c0_i32, %c0_i32_0 : i32, i32
  }
  func.func @transform_1(%arg0: i32, %arg1: i32) -> (i32, i32, i32, i32) {
    %c0_i32 = arith.constant 0 : i32
    %c0_i32_0 = arith.constant 0 : i32
    %c0_i32_1 = arith.constant 0 : i32
    return %arg0, %c0_i32, %c0_i32_0, %arg1 : i32, i32, i32, i32
  }
  func.func @transform_2(%arg0: i32, %arg1: i32) -> (i32, i32, i32, i32) {
    %c0_i32 = arith.constant 0 : i32
    %c0_i32_0 = arith.constant 0 : i32
    %c0_i32_1 = arith.constant 0 : i32
    return %arg0, %c0_i32, %c0_i32_0, %arg1 : i32, i32, i32, i32
  }
}

</mosaic_0001>

<bundles_post_ra>
// kernel: tpu_custom_call.1
= control target key start
LH: loop header
LB: loop body
LE: loop exit
PB: predicated region body
PF: predicated region fallthrough
CT: control target
= control target key end

     0   :  { %7 = vsyncpa [#allocation6], 0  ;;  %s3252_s0 = inlined_call_operand.hbm [shape: f32[3,3], index: 0, kind: input, shape index: {}]   ;;  %s3253_s1 = inlined_call_operand.hbm [shape: f32[2,16,16,128], index: 1, kind: input, shape index: {}]   ;;  %s3254_s2 = inlined_call_operand.hbm [shape: f32[2,16,16,128], index: 2, kind: output, shape index: {}]  }
   0x1   :  { %8 = vsyncpa [#allocation4], 0 }
   0x2   :  { %9 = vsyncpa [#allocation5], 0  ;;  %s2173_s9 = smov [#allocation3]   ;;  %s2174_s12 = smov [#allocation7]  }
   0x3   :  { %17 = dma.hbm_to_smem %s3252_s0, 64, %s2173_s9, [#allocation6]  }
   0x4   :  { %s23_s13 = sshll.u32 %s2174_s12, 4  ;;  %s24_s13 = int_to_ptr.vmem [resolvable:$true] %s23_s13 }
   0x5   :  { %s2135_s14 = scalar_lea.vmem %s24_s13, 8192  ;;  %p2140_p1 = scmp.lt.s32.totalorder %s24_s13, %s24_s13 }
   0x6   :  { %p2136_p0 = scmp.ne.s32.totalorder %s24_s13, %s2135_s14  ;;  %p2141_p2 = scmp.lt.s32.totalorder %s2135_s14, %s2135_s14 }
   0x8   :  { %p2142_p3 = por %p2141_p2, %p2140_p1 }
   0xa   :  { %p2143_p4 = pnand %p2142_p3, %p2136_p0 }
   0xc   :  { %2146 = shalt.err (!%p2143_p4)
}
   0xd   :  { %s2175_s15 = smov 128   ;;  %s2176_s16 = smov 8  }
   0xe   :  { %29 = dma.hbm_to_vmem [thread:$0]  %s3253_s1, 8192, %s24_s13, [#allocation4], %s2175_s15, %s2175_s15, %s2176_s16  }
   0xf   :  { %2167 = dma.done.wait [#allocation6], 64  }
  0x10   :  { %2168 = vsyncadd [#allocation6], 4294967232 }
  0x11   :  { %2169 = dma.done.wait [#allocation4], 8192  }
  0x12   :  { %2170 = vsyncadd [#allocation4], 4294959104 }
  0x13   :  { %36 = sfence }
  0x14   :  { %v2203_v0 = vld [vmem:[#allocation7] sm:$0xff]  ;;  %v2205_v1 = vld [vmem:[#allocation7 + $0x8] sm:$0xff]  ;;  %v2207_v2 = vld [vmem:[#allocation7 + $0x10] sm:$0xff]  ;;  %s2209_s0 = sld [smem:[#allocation3]]  ;;  %v2177_v3 = vmov 0.0   ;;  %s2178_s26 = smov [#allocation8]  }
  0x15   :  { %37 = vst [vmem:[#allocation2] sm:$0xff] %v2177_v3  ;;  %38 = vst [vmem:[#allocation2 + $0x8] sm:$0xff] %v2177_v3  ;;  %v2319_v4 = vld [vmem:[#allocation7 + $0x18] sm:$0xff]  ;;  %v2321_v5 = vld [vmem:[#allocation7 + $0x20] sm:$0xff]  ;;  %s2325_s1 = sld [smem:[#allocation3 + $0x1]]  ;;  %s2090_s27 = sshll.u32 %s2178_s26, 4  ;;  %s2091_s27 = int_to_ptr.vmem [resolvable:$true] %s2090_s27 }
  0x16   :  { %39 = vst [vmem:[#allocation2 + $0x10] sm:$0x3] %v2177_v3  ;;  %40 = vst [vmem:[#allocation2 + $0x18] sm:$0xff] %v2177_v3  ;;  %v2323_v6 = vld [vmem:[#allocation7 + $0x28] sm:$0xff]  ;;  %v2333_v7 = vld [vmem:[#allocation7 + $0x30] sm:$0xff]  ;;  %s2355_s19 = sld [smem:[#allocation3 + $0x2]]  ;;  %p2152_p6 = scmp.lt.s32.totalorder %s2091_s27, %s2091_s27 }
  0x17   :  { %41 = vst [vmem:[#allocation2 + $0x20] sm:$0xff] %v2177_v3  ;;  %42 = vst [vmem:[#allocation2 + $0x28] sm:$0x3] %v2177_v3  ;;  %v2335_v8 = vld [vmem:[#allocation7 + $0x38] sm:$0xff]  ;;  %v2337_v9 = vld [vmem:[#allocation7 + $0x40] sm:$0xff]  ;;  %s2359_s20 = sld [smem:[#allocation3 + $0x80]] }
  0x18   :  { %43 = vst [vmem:[#allocation2 + $0x30] sm:$0xff] %v2177_v3  ;;  %44 = vst [vmem:[#allocation2 + $0x38] sm:$0xff] %v2177_v3  ;;  %v2342_v10 = vld [vmem:[#allocation7 + $0x48] sm:$0xff]  ;;  %v2344_v11 = vld [vmem:[#allocation7 + $0x50] sm:$0xff]  ;;  %s2361_s21 = sld [smem:[#allocation3 + $0x81]]  ;;  %s2147_s28 = scalar_lea.vmem %s2091_s27, 8192 }
  0x19   :  { %45 = vst [vmem:[#allocation2 + $0x40] sm:$0x3] %v2177_v3  ;;  %46 = vst [vmem:[#allocation2 + $0x48] sm:$0xff] %v2177_v3  ;;  %v2346_v12 = vld [vmem:[#allocation7 + $0x58] sm:$0xff]  ;;  %v2351_v13 = vld [vmem:[#allocation7 + $0x60] sm:$0xff]  ;;  %s2363_s22 = sld [smem:[#allocation3 + $0x82]]  ;;  %p2148_p5 = scmp.ne.s32.totalorder %s2091_s27, %s2147_s28 }
  0x1a   :  { %47 = vst [vmem:[#allocation2 + $0x50] sm:$0xff] %v2177_v3  ;;  %48 = vst [vmem:[#allocation2 + $0x58] sm:$0x3] %v2177_v3  ;;  %v2353_v14 = vld [vmem:[#allocation7 + $0x68] sm:$0xff]  ;;  %v159_v15 = vld [vmem:[#allocation7 + $0x70] sm:$0xff]  ;;  %s2365_s23 = sld [smem:[#allocation3 + $0x100]]  ;;  %v2368_v31 = vstv %s2209_s0  ;;  %p2153_p7 = scmp.lt.s32.totalorder %s2147_s28, %s2147_s28 }
  0x1b   :  { %49 = vst [vmem:[#allocation2 + $0x60] sm:$0xff] %v2177_v3  ;;  %50 = vst [vmem:[#allocation2 + $0x68] sm:$0xff] %v2177_v3  ;;  %v160_v16 = vld [vmem:[#allocation7 + $0x78] sm:$0xff]  ;;  %v161_v17 = vld [vmem:[#allocation7 + $0x80] sm:$0xff]  ;;  %v2371_v32 = vstv %s2325_s1  ;;  %s2373_s24 = sld [smem:[#allocation3 + $0x101]]  ;;  %v2384_v42 = vmul.f32 0.0, %v2368_v31 }
  0x1c   :  { %51 = vst [vmem:[#allocation2 + $0x70] sm:$0x3] %v2177_v3  ;;  %52 = vst [vmem:[#allocation2 + $0x78] sm:$0xff] %v2177_v3  ;;  %v162_v18 = vld [vmem:[#allocation7 + $0x88] sm:$0xff]  ;;  %v163_v19 = vld [vmem:[#allocation7 + $0x90] sm:$0xff]  ;;  %s2377_s25 = sld [smem:[#allocation3 + $0x102]]  ;;  %v2387_v43 = vstv %s2355_s19  ;;  %v2391_v44 = vmul.f32 %v2371_v32, %v2203_v0  ;;  %v2398_v49 = vmul.f32 %v2371_v32, %v2205_v1  ;;  %v2402_v50 = vmul.f32 %v2371_v32, %v2207_v2  ;;  %p2154_p8 = por %p2153_p7, %p2152_p6 }
  0x1d   :  { %53 = vst [vmem:[#allocation2 + $0x80] sm:$0xff] %v2177_v3  ;;  %54 = vst [vmem:[#allocation2 + $0x88] sm:$0x3] %v2177_v3  ;;  %v164_v20 = vld [vmem:[#allocation7 + $0x98] sm:$0xff]  ;;  %v165_v21 = vld [vmem:[#allocation7 + $0xa0] sm:$0xff]  ;;  %v2394_v48 = vstv %s2359_s20  ;;  %v2406_v51 = vmul.f32 %v2371_v32, %v2319_v4  ;;  %v2413_v56 = vmul.f32 %v2371_v32, %v2321_v5  ;;  %v2417_v57 = vmul.f32 %v2371_v32, %v2323_v6 }
  0x1e   :  { %55 = vst [vmem:[#allocation2 + $0x90] sm:$0xff] %v2177_v3  ;;  %56 = vst [vmem:[#allocation2 + $0x98] sm:$0xff] %v2177_v3  ;;  %v166_v22 = vld [vmem:[#allocation7 + $0xa8] sm:$0xff]  ;;  %v167_v23 = vld [vmem:[#allocation7 + $0xb0] sm:$0xff]  ;;  %v2409_v55 = vstv %s2361_s21  ;;  %v2421_v58 = vmul.f32 %v2371_v32, %v2333_v7  ;;  %p2155_p9 = pnand %p2154_p8, %p2148_p5 }
  0x1f   :  { %57 = vst [vmem:[#allocation2 + $0xa0] sm:$0x3] %v2177_v3  ;;  %58 = vst [vmem:[#allocation2 + $0xa8] sm:$0xff] %v2177_v3  ;;  %v168_v24 = vld [vmem:[#allocation7 + $0xb8] sm:$0xff]  ;;  %v169_v25 = vld [vmem:[#allocation7 + $0xc0] sm:$0xff]  ;;  %v2425_v62 = vmul.f32 %v2409_v55, %v2203_v0  ;;  %v2428_v63 = vstv %s2363_s22 }
  0x20   :  { %59 = vst [vmem:[#allocation2 + $0xb0] sm:$0xff] %v2177_v3  ;;  %60 = vst [vmem:[#allocation2 + $0xb8] sm:$0x3] %v2177_v3  ;;  %v170_v26 = vld [vmem:[#allocation7 + $0xc8] sm:$0xff]  ;;  %v171_v27 = vld [vmem:[#allocation7 + $0xd0] sm:$0xff] }
  0x21   :  { %61 = vst [vmem:[#allocation2 + $0xc0] sm:$0xff] %v2177_v3  ;;  %62 = vst [vmem:[#allocation2 + $0xc8] sm:$0xff] %v2177_v3  ;;  %v172_v28 = vld [vmem:[#allocation7 + $0xd8] sm:$0xff]  ;;  %v173_v29 = vld [vmem:[#allocation7 + $0xe0] sm:$0xff] }
  0x22   :  { %63 = vst [vmem:[#allocation2 + $0xd0] sm:$0x3] %v2177_v3  ;;  %64 = vst [vmem:[#allocation2 + $0xd8] sm:$0xff] %v2177_v3  ;;  %v174_v30 = vld [vmem:[#allocation7 + $0xe8] sm:$0xff]  ;;  %v177_v33 = vld [vmem:[#allocation7 + $0x100] sm:$0xff] }
  0x23   :  { %65 = vst [vmem:[#allocation2 + $0xe0] sm:$0xff] %v2177_v3  ;;  %66 = vst [vmem:[#allocation2 + $0xe8] sm:$0x3] %v2177_v3  ;;  %v178_v34 = vld [vmem:[#allocation7 + $0x108] sm:$0xff]  ;;  %v2375_v35 = vld [vmem:[#allocation7 + $0x110] sm:$0xff] }
  0x24   :  { %67 = vst [vmem:[#allocation2 + $0xf0] sm:$0xff] %v2177_v3  ;;  %68 = vst [vmem:[#allocation2 + $0xf8] sm:$0xff] %v2177_v3  ;;  %v2380_v36 = vld [vmem:[#allocation7 + $0x118] sm:$0xff]  ;;  %v181_v37 = vld [vmem:[#allocation7 + $0x120] sm:$0xff] }
  0x25   :  { %69 = vst [vmem:[#allocation2 + $0x100] sm:$0x3] %v2177_v3  ;;  %70 = vst [vmem:[#allocation2 + $0x108] sm:$0xff] %v2177_v3  ;;  %v182_v38 = vld [vmem:[#allocation7 + $0x128] sm:$0xff]  ;;  %v183_v39 = vld [vmem:[#allocation7 + $0x130] sm:$0xff] }
  0x26   :  { %71 = vst [vmem:[#allocation2 + $0x110] sm:$0xff] %v2177_v3  ;;  %72 = vst [vmem:[#allocation2 + $0x118] sm:$0x3] %v2177_v3  ;;  %v184_v40 = vld [vmem:[#allocation7 + $0x138] sm:$0xff]  ;;  %v185_v41 = vld [vmem:[#allocation7 + $0x140] sm:$0xff] }
  0x27   :  { %73 = vst [vmem:[#allocation2 + $0x120] sm:$0xff] %v2177_v3  ;;  %74 = vst [vmem:[#allocation2 + $0x128] sm:$0xff] %v2177_v3  ;;  %v186_v45 = vld [vmem:[#allocation7 + $0x148] sm:$0xff]  ;;  %v187_v46 = vld [vmem:[#allocation7 + $0x150] sm:$0xff] }
  0x28   :  { %75 = vst [vmem:[#allocation2 + $0x130] sm:$0x3] %v2177_v3  ;;  %76 = vst [vmem:[#allocation2 + $0x138] sm:$0xff] %v2177_v3  ;;  %v188_v47 = vld [vmem:[#allocation7 + $0x158] sm:$0xff]  ;;  %v189_v52 = vld [vmem:[#allocation7 + $0x160] sm:$0xff] }
  0x29   :  { %77 = vst [vmem:[#allocation2 + $0x140] sm:$0xff] %v2177_v3  ;;  %78 = vst [vmem:[#allocation2 + $0x148] sm:$0x3] %v2177_v3  ;;  %v190_v53 = vld [vmem:[#allocation7 + $0x168] sm:$0xff]  ;;  %v191_v54 = vld [vmem:[#allocation7 + $0x170] sm:$0xff] }
  0x2a   :  { %79 = vst [vmem:[#allocation2 + $0x150] sm:$0xff] %v2177_v3  ;;  %80 = vst [vmem:[#allocation2 + $0x158] sm:$0xff] %v2177_v3  ;;  %v192_v59 = vld [vmem:[#allocation7 + $0x178] sm:$0xff]  ;;  %v193_v60 = vld [vmem:[#allocation7 + $0x180] sm:$0xff] }
  0x2b   :  { %81 = vst [vmem:[#allocation2 + $0x160] sm:$0x3] %v2177_v3  ;;  %82 = vst [vmem:[#allocation2 + $0x168] sm:$0xff] %v2177_v3  ;;  %v194_v61 = vld [vmem:[#allocation7 + $0x188] sm:$0xff] }
  0x2c   :  { %83 = vst [vmem:[#allocation2 + $0x170] sm:$0xff] %v2177_v3  ;;  %84 = vst [vmem:[#allocation2 + $0x178] sm:$0x3] %v2177_v3 }
  0x2d   :  { %85 = vst [vmem:[#allocation2 + $0x180] sm:$0xff] %v2177_v3  ;;  %86 = vst [vmem:[#allocation2 + $0x188] sm:$0xff] %v2177_v3 }
  0x2e   :  { %87 = vst [vmem:[#allocation2 + $0x190] sm:$0x3] %v2177_v3  ;;  %88 = vst [vmem:[#allocation2 + $0x198] sm:$0xff] %v2177_v3 }
  0x2f   :  { %89 = vst [vmem:[#allocation2 + $0x1a0] sm:$0xff] %v2177_v3  ;;  %90 = vst [vmem:[#allocation2 + $0x1a8] sm:$0x3] %v2177_v3 }
  0x30   :  { %91 = vst [vmem:[#allocation2 + $0x1b0] sm:$0xff] %v2177_v3  ;;  %92 = vst [vmem:[#allocation2 + $0x1b8] sm:$0xff] %v2177_v3 }
  0x31   :  { %93 = vst [vmem:[#allocation2 + $0x1c0] sm:$0x3] %v2177_v3  ;;  %94 = vst [vmem:[#allocation2 + $0x1c8] sm:$0xff] %v2177_v3 }
  0x32   :  { %95 = vst [vmem:[#allocation2 + $0x1d0] sm:$0xff] %v2177_v3  ;;  %96 = vst [vmem:[#allocation2 + $0x1d8] sm:$0x3] %v2177_v3 }
  0x33   :  { %97 = vst [vmem:[#allocation2 + $0x1e0] sm:$0xff] %v2177_v3  ;;  %98 = vst [vmem:[#allocation2 + $0x1e8] sm:$0xff] %v2177_v3 }
  0x34   :  { %99 = vst [vmem:[#allocation2 + $0x1f0] sm:$0x3] %v2177_v3  ;;  %100 = vst [vmem:[#allocation2 + $0x1f8] sm:$0xff] %v2177_v3 }
  0x35   :  { %101 = vst [vmem:[#allocation2 + $0x200] sm:$0xff] %v2177_v3  ;;  %102 = vst [vmem:[#allocation2 + $0x208] sm:$0x3] %v2177_v3 }
  0x36   :  { %103 = vst [vmem:[#allocation2 + $0x210] sm:$0xff] %v2177_v3  ;;  %104 = vst [vmem:[#allocation2 + $0x218] sm:$0xff] %v2177_v3 }
  0x37   :  { %105 = vst [vmem:[#allocation2 + $0x220] sm:$0x3] %v2177_v3  ;;  %106 = vst [vmem:[#allocation2 + $0x228] sm:$0xff] %v2177_v3 }
  0x38   :  { %107 = vst [vmem:[#allocation2 + $0x230] sm:$0xff] %v2177_v3  ;;  %108 = vst [vmem:[#allocation2 + $0x238] sm:$0x3] %v2177_v3 }
  0x39   :  { %109 = vst [vmem:[#allocation2 + $0x240] sm:$0xff] %v2177_v3  ;;  %110 = vst [vmem:[#allocation2 + $0x248] sm:$0xff] %v2177_v3 }
  0x3a   :  { %111 = vst [vmem:[#allocation2 + $0x250] sm:$0x3] %v2177_v3  ;;  %112 = vst [vmem:[#allocation2 + $0x258] sm:$0xff] %v2177_v3 }
  0x3b   :  { %113 = vst [vmem:[#allocation2 + $0x260] sm:$0xff] %v2177_v3  ;;  %114 = vst [vmem:[#allocation2 + $0x268] sm:$0x3] %v2177_v3 }
  0x3c   :  { %115 = vst [vmem:[#allocation2 + $0x270] sm:$0xff] %v2177_v3  ;;  %116 = vst [vmem:[#allocation2 + $0x278] sm:$0xff] %v2177_v3 }
  0x3d   :  { %117 = vst [vmem:[#allocation2 + $0x280] sm:$0x3] %v2177_v3  ;;  %118 = vst [vmem:[#allocation2 + $0x288] sm:$0xff] %v2177_v3 }
  0x3e   :  { %119 = vst [vmem:[#allocation2 + $0x290] sm:$0xff] %v2177_v3  ;;  %120 = vst [vmem:[#allocation2 + $0x298] sm:$0x3] %v2177_v3 }
  0x3f   :  { %121 = vst [vmem:[#allocation2 + $0x2a0] sm:$0xff] %v2177_v3  ;;  %122 = vst [vmem:[#allocation2 + $0x2a8] sm:$0xff] %v2177_v3 }
  0x40   :  { %123 = vst [vmem:[#allocation2 + $0x2b0] sm:$0x3] %v2177_v3  ;;  %124 = vst [vmem:[#allocation2 + $0x2b8] sm:$0xff] %v2177_v3 }
  0x41   :  { %125 = vst [vmem:[#allocation2 + $0x2c0] sm:$0xff] %v2177_v3  ;;  %126 = vst [vmem:[#allocation2 + $0x2c8] sm:$0x3] %v2177_v3 }
  0x42   :  { %127 = vst [vmem:[#allocation2 + $0x2d0] sm:$0xff] %v2177_v3  ;;  %128 = vst [vmem:[#allocation2 + $0x2d8] sm:$0xff] %v2177_v3 }
  0x43   :  { %129 = vst [vmem:[#allocation2 + $0x2e0] sm:$0x3] %v2177_v3  ;;  %130 = vst [vmem:[#allocation2 + $0x2e8] sm:$0xff] %v2177_v3 }
  0x44   :  { %131 = vst [vmem:[#allocation2 + $0x2f0] sm:$0xff] %v2177_v3  ;;  %132 = vst [vmem:[#allocation2 + $0x2f8] sm:$0x3] %v2177_v3 }
  0x45   :  { %133 = vst [vmem:[#allocation2 + $0x300] sm:$0xff] %v2177_v3  ;;  %134 = vst [vmem:[#allocation2 + $0x308] sm:$0xff] %v2177_v3 }
  0x46   :  { %135 = vst [vmem:[#allocation2 + $0x310] sm:$0x3] %v2177_v3  ;;  %136 = vst [vmem:[#allocation2 + $0x318] sm:$0xff] %v2177_v3 }
  0x47   :  { %137 = vst [vmem:[#allocation2 + $0x320] sm:$0xff] %v2177_v3  ;;  %138 = vst [vmem:[#allocation2 + $0x328] sm:$0x3] %v2177_v3 }
  0x48   :  { %139 = vst [vmem:[#allocation2 + $0x330] sm:$0xff] %v2177_v3  ;;  %140 = vst [vmem:[#allocation2 + $0x338] sm:$0xff] %v2177_v3 }
  0x49   :  { %141 = vst [vmem:[#allocation2 + $0x340] sm:$0x3] %v2177_v3  ;;  %142 = vst [vmem:[#allocation2 + $0x348] sm:$0xff] %v2177_v3 }
  0x4a   :  { %143 = vst [vmem:[#allocation2 + $0x350] sm:$0xff] %v2177_v3  ;;  %144 = vst [vmem:[#allocation2 + $0x358] sm:$0x3] %v2177_v3  ;;  %v2432_v3 = vmul.f32 %v2371_v32, %v2335_v8 }
  0x4b   :  { %210 = vst [vmem:[#allocation2 + $0x19] sm:$0xff] %v2203_v0  ;;  %211 = vst [vmem:[#allocation2 + $0x21] sm:$0xff] %v2205_v1  ;;  %v2443_v0 = vmul.f32 %v2409_v55, %v2205_v1  ;;  %v2460_v1 = vmul.f32 %v2409_v55, %v2319_v4 }
  0x4c   :  { %212 = vst [vmem:[#allocation2 + $0x31] sm:$0xff] %v2207_v2  ;;  %213 = vst [vmem:[#allocation2 + $0x39] sm:$0xff] %v2319_v4 }
  0x4d   :  { %214 = vst [vmem:[#allocation2 + $0x49] sm:$0xff] %v2321_v5  ;;  %215 = vst [vmem:[#allocation2 + $0x51] sm:$0xff] %v2323_v6 }
  0x4e   :  { %216 = vst [vmem:[#allocation2 + $0x61] sm:$0xff] %v2333_v7  ;;  %217 = vst [vmem:[#allocation2 + $0x69] sm:$0xff] %v2335_v8 }
  0x4f   :  { %218 = vst [vmem:[#allocation2 + $0x79] sm:$0xff] %v2337_v9  ;;  %219 = vst [vmem:[#allocation2 + $0x81] sm:$0xff] %v2342_v10 }
  0x50   :  { %220 = vst [vmem:[#allocation2 + $0x91] sm:$0xff] %v2344_v11  ;;  %221 = vst [vmem:[#allocation2 + $0x99] sm:$0xff] %v2346_v12 }
  0x51   :  { %3260 = vst [vmem:[#allocation12_spill] sm:$0xff] %v2351_v13  ;;  %222 = vst [vmem:[#allocation2 + $0xa9] sm:$0xff] %v2351_v13 }
  0x52   :  { %223 = vst [vmem:[#allocation2 + $0xb1] sm:$0xff] %v2353_v14  ;;  %224 = vst [vmem:[#allocation2 + $0xc1] sm:$0xff] %v159_v15  ;;  %v2436_v15 = vmul.f32 %v2371_v32, %v2337_v9 }
  0x53   :  { %225 = vst [vmem:[#allocation2 + $0xc9] sm:$0xff] %v160_v16  ;;  %226 = vst [vmem:[#allocation2 + $0xd9] sm:$0xff] %v161_v17  ;;  %v195_v16 = vld [vmem:[#allocation7 + $0x190] sm:$0xff]  ;;  %v196_v17 = vld [vmem:[#allocation7 + $0x198] sm:$0xff] }
  0x54   :  { %227 = vst [vmem:[#allocation2 + $0xe1] sm:$0xff] %v162_v18  ;;  %228 = vst [vmem:[#allocation2 + $0xf1] sm:$0xff] %v163_v19  ;;  %v197_v18 = vld [vmem:[#allocation7 + $0x1a0] sm:$0xff]  ;;  %v2439_v19 = vstv %s2365_s23 }
  0x55   :  { %229 = vst [vmem:[#allocation2 + $0xf9] sm:$0xff] %v164_v20  ;;  %230 = vst [vmem:[#allocation2 + $0x109] sm:$0xff] %v165_v21  ;;  %v2446_v20 = vmul.f32 %v2409_v55, %v177_v33  ;;  %v2449_v21 = vmul.f32 %v2409_v55, %v178_v34 }
  0x56   :  { %231 = vst [vmem:[#allocation2 + $0x111] sm:$0xff] %v166_v22  ;;  %232 = vst [vmem:[#allocation2 + $0x121] sm:$0xff] %v167_v23  ;;  %v198_v22 = vld [vmem:[#allocation7 + $0x1a8] sm:$0xff]  ;;  %v199_v23 = vld [vmem:[#allocation7 + $0x1b0] sm:$0xff] }
  0x57   :  { %233 = vst [vmem:[#allocation2 + $0x129] sm:$0xff] %v168_v24  ;;  %234 = vst [vmem:[#allocation2 + $0x139] sm:$0xff] %v169_v25  ;;  %v200_v24 = vld [vmem:[#allocation7 + $0x1b8] sm:$0xff]  ;;  %v2452_v25 = vstv %s2373_s24 }
  0x58   :  { %235 = vst [vmem:[#allocation2 + $0x141] sm:$0xff] %v170_v26  ;;  %236 = vst [vmem:[#allocation2 + $0x151] sm:$0xff] %v171_v27  ;;  %v2456_v26 = vmul.f32 %v2409_v55, %v2207_v2  ;;  %v2464_v27 = vmul.f32 %v2409_v55, %v2321_v5 }
  0x59   :  { %237 = vst [vmem:[#allocation2 + $0x159] sm:$0xff] %v172_v28  ;;  %238 = vst [vmem:[#allocation2 + $0x169] sm:$0xff] %v173_v29  ;;  %v201_v28 = vld [vmem:[#allocation7 + $0x1c0] sm:$0xff]  ;;  %v202_v29 = vld [vmem:[#allocation7 + $0x1c8] sm:$0xff] }
  0x5a   :  { %239 = vst [vmem:[#allocation2 + $0x171] sm:$0xff] %v174_v30  ;;  %242 = vst [vmem:[#allocation2 + $0x1c9] sm:$0xff] %v177_v33  ;;  %v203_v30 = vld [vmem:[#allocation7 + $0x1d0] sm:$0xff]  ;;  %v2468_v33 = vmul.f32 %v2452_v25, %v2207_v2  ;;  %v2483_v2 = vmul.f32 %v2452_v25, %v2319_v4  ;;  %v2499_v4 = vmul.f32 %v2452_v25, %v2323_v6 }
  0x5b   :  { %243 = vst [vmem:[#allocation2 + $0x1d1] sm:$0xff] %v178_v34  ;;  %244 = vst [vmem:[#allocation2 + $0x1e1] sm:$0xff] %v2375_v35  ;;  %v2471_v34 = vstv %s2377_s25 }
  0x5c   :  { %245 = vst [vmem:[#allocation2 + $0x1e9] sm:$0xff] %v2380_v36  ;;  %246 = vst [vmem:[#allocation2 + $0x1f9] sm:$0xff] %v181_v37  ;;  %v2475_v37 = vmul.f32 %v2409_v55, %v2323_v6  ;;  %v2515_v6 = vmul.f32 %v2409_v55, %v2335_v8 }
  0x5d   :  { %247 = vst [vmem:[#allocation2 + $0x201] sm:$0xff] %v182_v38  ;;  %248 = vst [vmem:[#allocation2 + $0x211] sm:$0xff] %v183_v39  ;;  %v2479_v38 = vmul.f32 %v2409_v55, %v2333_v7  ;;  %v204_v39 = vld [vmem:[#allocation7 + $0x1d8] sm:$0xff] }
  0x5e   :  { %249 = vst [vmem:[#allocation2 + $0x219] sm:$0xff] %v184_v40  ;;  %250 = vst [vmem:[#allocation2 + $0x229] sm:$0xff] %v185_v41  ;;  %v205_v40 = vld [vmem:[#allocation7 + $0x1e0] sm:$0xff]  ;;  %v206_v41 = vld [vmem:[#allocation7 + $0x1e8] sm:$0xff] }
  0x5f   :  { %251 = vst [vmem:[#allocation2 + $0x231] sm:$0xff] %v186_v45  ;;  %252 = vst [vmem:[#allocation2 + $0x241] sm:$0xff] %v187_v46  ;;  %v2487_v45 = vmul.f32 %v2452_v25, %v2375_v35  ;;  %v2491_v46 = vmul.f32 %v2452_v25, %v2380_v36  ;;  %v2503_v35 = vmul.f32 %v2452_v25, %v2333_v7 }
  0x60   :  { %253 = vst [vmem:[#allocation2 + $0x249] sm:$0xff] %v188_v47  ;;  %3261 = vst [vmem:[#allocation13_spill] sm:$0xff] %v2409_v55  ;;  %v2495_v47 = vmul.f32 %v2452_v25, %v2321_v5  ;;  %v2507_v36 = vmul.f32 %v2452_v25, %v2335_v8  ;;  %v2511_v5 = vmul.f32 %v2452_v25, %v2337_v9  ;;  %v1244_v8 = vld [vmem:[#allocation2 + $0x1a] sm:$0xff] }
  0x61   :  { %3262 = vst [vmem:[#allocation14_spill] sm:$0xff] %v2413_v56  ;;  %3263 = vst [vmem:[#allocation15_spill] sm:$0xff] %v2417_v57  ;;  %v2519_v7 = vmul.f32 %v2452_v25, %v2342_v10 }
  0x62   :  { %3264 = vst [vmem:[#allocation16_spill] sm:$0xff] %v2421_v58  ;;  %254 = vst [vmem:[#allocation2 + $0x259] sm:$0xff] %v189_v52  ;;  %v175_v52 = vld [vmem:[#allocation7 + $0xf0] sm:$0xff] }
  0x63   :  { %255 = vst [vmem:[#allocation2 + $0x261] sm:$0xff] %v190_v53  ;;  %256 = vst [vmem:[#allocation2 + $0x271] sm:$0xff] %v191_v54  ;;  %v176_v53 = vld [vmem:[#allocation7 + $0xf8] sm:$0xff]  ;;  %v207_v54 = vld [vmem:[#allocation7 + $0x1f0] sm:$0xff] }
  0x64   :  { %3265 = vst [vmem:[#allocation17_spill] sm:$0xff] %v2432_v3  ;;  %3266 = vst [vmem:[#allocation18_spill] sm:$0xff] %v2436_v15  ;;  %v1471_v3 = vld [vmem:[#allocation2 + $0x1e0] sm:$0xff] }
  0x65   :  { %257 = vst [vmem:[#allocation2 + $0x279] sm:$0xff] %v192_v59  ;;  %258 = vst [vmem:[#allocation2 + $0x289] sm:$0xff] %v193_v60  ;;  %v208_v59 = vld [vmem:[#allocation7 + $0x1f8] sm:$0xff]  ;;  %v468_v60 = vld [vmem:[#allocation2 + $0x1] sm:$0xff] }
  0x66   :  { %259 = vst [vmem:[#allocation2 + $0x291] sm:$0xff] %v194_v61  ;;  %260 = vst [vmem:[#allocation2 + $0x2a1] sm:$0xff] %v195_v16  ;;  %v662_v61 = vld [vmem:[#allocation2 + $0x2] sm:$0xff]  ;;  %v2523_v16 = vmul.f32 %v2409_v55, %v2337_v9  ;;  %v2539_v9 = vmul.f32 %v2452_v25, %v2346_v12 }
  0x67   :  { %261 = vst [vmem:[#allocation2 + $0x2a9] sm:$0xff] %v196_v17  ;;  %262 = vst [vmem:[#allocation2 + $0x2b9] sm:$0xff] %v197_v18  ;;  %v2527_v17 = vmul.f32 %v2452_v25, %v2344_v11  ;;  %v534_v18 = vmul.f32 %v2371_v32, %v468_v60 }
  0x68   :  { %3267 = vst [vmem:[#allocation19_spill] sm:$0xff] %v2452_v25  ;;  %263 = vst [vmem:[#allocation2 + $0x2c1] sm:$0xff] %v198_v22  ;;  %v728_v22 = vmul.f32 %v2387_v43, %v662_v61  ;;  %v857_v61 = vld [vmem:[#allocation2 + $0x20] sm:$0xff] }
  0x69   :  { %264 = vst [vmem:[#allocation2 + $0x2d1] sm:$0xff] %v199_v23  ;;  %265 = vst [vmem:[#allocation2 + $0x2d9] sm:$0xff] %v200_v24  ;;  %v856_v23 = vld [vmem:[#allocation2 + $0x18] sm:$0xff]  ;;  %v2531_v24 = vld [vmem:[#allocation2 + $0x30] sm:$0xff] }
  0x6a   :  { %3268 = vst [vmem:[#allocation20_spill] sm:$0xff] %v2475_v37  ;;  %3269 = vst [vmem:[#allocation21_spill] sm:$0xff] %v2479_v38 }
  0x6b   :  { %266 = vst [vmem:[#allocation2 + $0x2e9] sm:$0xff] %v201_v28  ;;  %267 = vst [vmem:[#allocation2 + $0x2f1] sm:$0xff] %v202_v29  ;;  %v2535_v28 = vmul.f32 %v2409_v55, %v2342_v10  ;;  %v2541_v29 = vld [vmem:[#allocation2 + $0x32] sm:$0xff] }
  0x6c   :  { %268 = vst [vmem:[#allocation2 + $0x301] sm:$0xff] %v203_v30  ;;  %269 = vst [vmem:[#allocation2 + $0x309] sm:$0xff] %v204_v39  ;;  %v469_v30 = vld [vmem:[#allocation2 + $0x9] sm:$0xff] }
  0x6d   :  { %270 = vst [vmem:[#allocation2 + $0x319] sm:$0xff] %v205_v40  ;;  %271 = vst [vmem:[#allocation2 + $0x321] sm:$0xff] %v206_v41  ;;  %v663_v39 = vld [vmem:[#allocation2 + $0xa] sm:$0xff]  ;;  %v2545_v40 = vmul.f32 %v2409_v55, %v2344_v11  ;;  %v2549_v41 = vmul.f32 %v2452_v25, %v2351_v13  ;;  %v922_v13 = vmul.f32 %v2394_v48, %v856_v23 }
  0x6e   :  { %3270 = vst [vmem:[#allocation22_spill] sm:$0xff] %v2503_v35  ;;  %3271 = vst [vmem:[#allocation23_spill] sm:$0xff] %v2507_v36  ;;  %v729_v60 = vmul.f32 %v2387_v43, %v663_v39  ;;  %v1893_v39 = vmul.f32 %v2471_v34, %v2541_v29  ;;  %v1859_v36 = vld [vmem:[#allocation2 + $0x1e2] sm:$0xff]  ;;  %v889_v35 = vld [vmem:[#allocation2 + $0x1d0] sm:$0xff] }
  0x6f   :  { %3272 = vst [vmem:[#allocation24_spill] sm:$0xff] %v2511_v5  ;;  %240 = vst [vmem:[#allocation2 + $0x181] sm:$0xff] %v175_v52  ;;  %v2553_v52 = vmul.f32 %v2371_v32, %v2342_v10  ;;  %v1310_v10 = vmul.f32 %v2428_v63, %v1244_v8  ;;  %v955_v56 = vmul.f32 %v2394_v48, %v889_v35 }
  0x70   :  { %241 = vst [vmem:[#allocation2 + $0x189] sm:$0xff] %v176_v53  ;;  %272 = vst [vmem:[#allocation2 + $0x331] sm:$0xff] %v207_v54  ;;  %v2557_v53 = vmul.f32 %v2409_v55, %v2346_v12  ;;  %v598_v54 = vadd.f32 %v534_v18, %v2384_v42  ;;  %v1505_v12 = vmul.f32 %v2439_v19, %v2531_v24  ;;  %v694_v55 = vld [vmem:[#allocation2 + $0x1b2] sm:$0xff] }
  0x71   :  { %3273 = vst [vmem:[#allocation25_spill] sm:$0xff] %v2515_v6  ;;  %3274 = vst [vmem:[#allocation26_spill] sm:$0xff] %v2519_v7  ;;  %v2571_v18 = vmul.f32 %v2452_v25, %v2353_v14  ;;  %v923_v7 = vmul.f32 %v2394_v48, %v857_v61  ;;  %v760_v14 = vmul.f32 %v2387_v43, %v694_v55 }
  0x72   :  { %3275 = vst [vmem:[#allocation27_spill] sm:$0xff] %v2523_v16  ;;  %3276 = vst [vmem:[#allocation28_spill] sm:$0xff] %v2527_v17  ;;  %v2576_v17 = vld [vmem:[#allocation2 + $0x3a] sm:$0xff] }
  0x73   :  { %273 = vst [vmem:[#allocation2 + $0x339] sm:$0xff] %v208_v59  ;;  %3277 = vst [vmem:[#allocation29_spill] sm:$0xff] %v2535_v28  ;;  %v535_v59 = vmul.f32 %v2371_v32, %v469_v30  ;;  %v792_v30 = vadd.f32 %v728_v22, %v598_v54  ;;  %v888_v28 = vld [vmem:[#allocation2 + $0x1c8] sm:$0xff]  ;;  %v501_v54 = vld [vmem:[#allocation2 + $0x1b9] sm:$0xff]  ;;  %v1894_v6 = vmul.f32 %v2471_v34, %v2576_v17 }
  0x74   :  { %3278 = vst [vmem:[#allocation30_spill] sm:$0xff] %v2539_v9  ;;  %3279 = vst [vmem:[#allocation31_spill] sm:$0xff] %v2545_v40  ;;  %v1245_v9 = vld [vmem:[#allocation2 + $0x22] sm:$0xff]  ;;  %v2562_v40 = vld [vmem:[#allocation2 + $0x38] sm:$0xff]  ;;  %v954_v38 = vmul.f32 %v2394_v48, %v888_v28  ;;  %v567_v58 = vmul.f32 %v2371_v32, %v501_v54  ;;  %v730_v28 = vmul.f32 %v1244_v8, %v2387_v43 }
  0x75   :  { %3280 = vst [vmem:[#allocation32_spill] sm:$0xff] %v2549_v41  ;;  %3281 = vst [vmem:[#allocation33_spill] sm:$0xff] %v2553_v52  ;;  %v342_v41 = vmul.f32 %v856_v23, %v2368_v31  ;;  %v599_v52 = vadd.f32 %v535_v59, %v2384_v42  ;;  %v1311_v15 = vmul.f32 %v2428_v63, %v1245_v9  ;;  %v1276_v22 = vld [vmem:[#allocation2 + $0x1ca] sm:$0xff] }
  0x76   :  { %3282 = vst [vmem:[#allocation34_spill] sm:$0xff] %v2557_v53  ;;  %v500_v53 = vld [vmem:[#allocation2 + $0x1b1] sm:$0xff]  ;;  %3283 = vst [vmem:[#allocation35_spill] sm:$0xff] %v2571_v18  ;;  %v1506_v5 = vmul.f32 %v2439_v19, %v2562_v40  ;;  %v695_v18 = vld [vmem:[#allocation2 + $0x1ba] sm:$0xff]  ;;  %v986_v25 = vadd.f32 %v922_v13, %v792_v30  ;;  %v731_v35 = vmul.f32 %v1245_v9, %v2387_v43 }
  0x77   :  { %v566_v23 = vmul.f32 %v2371_v32, %v500_v53  ;;  %v793_v16 = vadd.f32 %v729_v60, %v599_v52  ;;  %v600_v53 = vadd.f32 %v2391_v44, %v342_v41  ;;  %v761_v55 = vmul.f32 %v2387_v43, %v695_v18  ;;  %v1277_v30 = vld [vmem:[#allocation2 + $0x1d2] sm:$0xff] }
  0x78   :  { %v1180_v37 = vadd.f32 %v2425_v62, %v986_v25  ;;  %v1342_v60 = vmul.f32 %v2428_v63, %v1276_v22  ;;  %v1925_v44 = vmul.f32 %v2471_v34, %v1859_v36  ;;  %v631_v41 = vadd.f32 %v567_v58, %v2384_v42  ;;  %v1472_v62 = vld [vmem:[#allocation2 + $0x1e8] sm:$0xff] }
  0x79   :  { %v630_v59 = vadd.f32 %v566_v23, %v2384_v42  ;;  %v987_v13 = vadd.f32 %v923_v7, %v793_v16  ;;  %v1537_v23 = vmul.f32 %v2439_v19, %v1471_v3  ;;  %v1343_v7 = vmul.f32 %v2428_v63, %v1277_v30 }
  0x7a   :  { %v1374_v57 = vadd.f32 %v1310_v10, %v1180_v37  ;;  %v825_v25 = vadd.f32 %v761_v55, %v631_v41  ;;  %v794_v16 = vadd.f32 %v730_v28, %v600_v53  ;;  %v924_v3 = vmul.f32 %v2531_v24, %v2394_v48 }
  0x7b   :  { %v824_v52 = vadd.f32 %v760_v14, %v630_v59  ;;  %v1181_v54 = vadd.f32 %v2443_v0, %v987_v13  ;;  %v343_v58 = vmul.f32 %v857_v61, %v2368_v31  ;;  %v1538_v0 = vmul.f32 %v2439_v19, %v1472_v62  ;;  %v1441_v59 = vld [vmem:[#allocation2 + $0x48] sm:$0xff] }
  0x7c   :  { %v1569_v14 = vadd.f32 %v1505_v12, %v1374_v57  ;;  %v1019_v37 = vadd.f32 %v955_v56, %v825_v25  ;;  %v1312_v56 = vmul.f32 %v2541_v29, %v2428_v63  ;;  %v925_v61 = vmul.f32 %v2562_v40, %v2394_v48 }
  0x7d   :  { %v1018_v18 = vadd.f32 %v954_v38, %v824_v52  ;;  %v1375_v36 = vadd.f32 %v1311_v15, %v1181_v54  ;;  %v988_v38 = vadd.f32 %v924_v3, %v794_v16  ;;  %v601_v53 = vadd.f32 %v2398_v49, %v343_v58  ;;  %v1860_v15 = vld [vmem:[#allocation2 + $0x1ea] sm:$0xff] }
  0x7e   :  { %v1763_v8 = vadd.f32 %v2468_v33, %v1569_v14  ;;  %v1213_v57 = vadd.f32 %v2449_v21, %v1019_v37  ;;  %v1507_v49 = vmul.f32 %v2439_v19, %v1441_v59  ;;  %v1829_v52 = vld [vmem:[#allocation2 + $0x4a] sm:$0xff]  ;;  %v344_v21 = vmul.f32 %v2531_v24, %v2368_v31  ;;  %v1831_v14 = vld [vmem:[#allocation2 + $0x62] sm:$0xff] }
  0x7f   :  { %v1212_v42 = vadd.f32 %v2446_v20, %v1018_v18  ;;  %v1570_v10 = vadd.f32 %v1506_v5, %v1375_v36  ;;  %v1182_v20 = vadd.f32 %v2456_v26, %v988_v38  ;;  %v795_v5 = vadd.f32 %v731_v35, %v601_v53 }
  0x80   :  { %v1957_v12 = vadd.f32 %v1893_v39, %v1763_v8  ;;  %v1407_v55 = vadd.f32 %v1343_v7, %v1213_v57  ;;  %v1926_v30 = vmul.f32 %v2471_v34, %v1860_v15  ;;  %v732_v54 = vmul.f32 %v2541_v29, %v2387_v43 }
  0x81   :  { %v1406_v22 = vadd.f32 %v1342_v60, %v1212_v42  ;;  %v1764_v9 = vadd.f32 %v2483_v2, %v1570_v10  ;;  %v1376_v13 = vadd.f32 %v1312_v56, %v1182_v20  ;;  %v989_v41 = vadd.f32 %v925_v61, %v795_v5  ;;  %v1442_v2 = vld [vmem:[#allocation2 + $0x50] sm:$0xff]  ;;  %v1444_v10 = vld [vmem:[#allocation2 + $0x68] sm:$0xff] }
  0x82   :  { %2021 = vst [vmem:[#allocation8] sm:$0xff] %v1957_v12  ;;  %v1602_v39 = vadd.f32 %v1538_v0, %v1407_v55  ;;  %v1895_v62 = vmul.f32 %v2471_v34, %v1829_v52  ;;  %v1508_v29 = vmul.f32 %v2439_v19, %v1442_v2  ;;  %v2635_v36 = vmul.f32 %v2371_v32, %v2344_v11  ;;  %v3284_v56 = vld [vmem:[#allocation14_spill] sm:$0xff] }
  0x83   :  { %v1601_v33 = vadd.f32 %v1537_v23, %v1406_v22  ;;  %v1958_v26 = vadd.f32 %v1894_v6, %v1764_v9  ;;  %v1571_v28 = vadd.f32 %v1507_v49, %v1376_v13  ;;  %v602_v23 = vadd.f32 %v2402_v50, %v344_v21  ;;  %v1830_v6 = vld [vmem:[#allocation2 + $0x52] sm:$0xff] }
  0x84   :  { %v1183_v24 = vadd.f32 %v2460_v1, %v989_v41  ;;  %v1796_v25 = vadd.f32 %v2491_v46, %v1602_v39  ;;  %v926_v50 = vmul.f32 %v1441_v59, %v2394_v48  ;;  %v345_v1 = vmul.f32 %v2562_v40, %v2368_v31  ;;  %v1445_v13 = vld [vmem:[#allocation2 + $0x78] sm:$0xff] }
  0x85   :  { %v1795_v60 = vadd.f32 %v2487_v45, %v1601_v33  ;;  %2022 = vst [vmem:[#allocation8 + $0x8] sm:$0xff] %v1958_v26  ;;  %v1313_v45 = vmul.f32 %v2576_v17, %v2428_v63  ;;  %v1765_v7 = vadd.f32 %v2495_v47, %v1571_v28  ;;  %v796_v16 = vadd.f32 %v732_v54, %v602_v23  ;;  %v3285_v49 = vld [vmem:[#allocation15_spill] sm:$0xff] }
  0x86   :  { %v1990_v42 = vadd.f32 %v1926_v30, %v1796_v25  ;;  %v1896_v47 = vmul.f32 %v2471_v34, %v1830_v6  ;;  %v1314_v0 = vmul.f32 %v1829_v52, %v2428_v63  ;;  %v603_v38 = vadd.f32 %v2406_v51, %v345_v1  ;;  %v1833_v39 = vld [vmem:[#allocation2 + $0x7a] sm:$0xff] }
  0x87   :  { %v1989_v18 = vadd.f32 %v1925_v44, %v1795_v60  ;;  %v1377_v3 = vadd.f32 %v1313_v45, %v1183_v24  ;;  %v1443_v44 = vld [vmem:[#allocation2 + $0x60] sm:$0xff]  ;;  %v1959_v46 = vadd.f32 %v1895_v62, %v1765_v7  ;;  %v990_v58 = vadd.f32 %v926_v50, %v796_v16 }
  0x88   :  { %v733_v35 = vmul.f32 %v2576_v17, %v2387_v43  ;;  %2054 = vst [vmem:[#allocation8 + $0x108] sm:$0xff] %v1990_v42  ;;  %v1509_v11 = vmul.f32 %v2439_v19, %v1443_v44  ;;  %v1897_v8 = vmul.f32 %v2471_v34, %v1831_v14  ;;  %v346_v22 = vmul.f32 %v1441_v59, %v2368_v31  ;;  %v1832_v17 = vld [vmem:[#allocation2 + $0x6a] sm:$0xff]  ;;  %v3286_v60 = vld [vmem:[#allocation20_spill] sm:$0xff] }
  0x89   :  { %2053 = vst [vmem:[#allocation8 + $0x100] sm:$0xff] %v1989_v18  ;;  %v1572_v37 = vadd.f32 %v1508_v29, %v1377_v3  ;;  %2023 = vst [vmem:[#allocation8 + $0x10] sm:$0xff] %v1959_v46  ;;  %v1184_v40 = vadd.f32 %v2464_v27, %v990_v58  ;;  %v927_v15 = vmul.f32 %v1442_v2, %v2394_v48  ;;  %v3288_v25 = vld [vmem:[#allocation16_spill] sm:$0xff]  ;;  %v3289_v3 = vld [vmem:[#allocation21_spill] sm:$0xff] }
  0x8a   :  { %v797_v57 = vadd.f32 %v733_v35, %v603_v38  ;;  %v1315_v51 = vmul.f32 %v1830_v6, %v2428_v63  ;;  %v604_v61 = vadd.f32 %v3284_v56, %v346_v22  ;;  %v734_v27 = vmul.f32 %v1829_v52, %v2387_v43 }
  0x8b   :  { %v1766_v53 = vadd.f32 %v2499_v4, %v1572_v37  ;;  %v1378_v20 = vadd.f32 %v1314_v0, %v1184_v40  ;;  %v347_v12 = vmul.f32 %v1442_v2, %v2368_v31  ;;  %v1510_v5 = vmul.f32 %v2439_v19, %v1444_v10  ;;  %v3287_v2 = vld [vmem:[#allocation22_spill] sm:$0xff]  ;;  %v3290_v0 = vld [vmem:[#allocation25_spill] sm:$0xff]  ;;  %v3291_v40 = vld [vmem:[#allocation23_spill] sm:$0xff] }
  0x8c   :  { %v991_v33 = vadd.f32 %v927_v15, %v797_v57  ;;  %v928_v59 = vmul.f32 %v1443_v44, %v2394_v48  ;;  %v798_v55 = vadd.f32 %v734_v27, %v604_v61  ;;  %v735_v26 = vmul.f32 %v1830_v6, %v2387_v43  ;;  %v1446_v6 = vld [vmem:[#allocation2 + $0x80] sm:$0xff]  ;;  %v3292_v57 = vld [vmem:[#allocation17_spill] sm:$0xff] }
  0x8d   :  { %v1960_v9 = vadd.f32 %v1896_v47, %v1766_v53  ;;  %v1573_v4 = vadd.f32 %v1509_v11, %v1378_v20  ;;  %v605_v21 = vadd.f32 %v3285_v49, %v347_v12  ;;  %v1898_v52 = vmul.f32 %v2471_v34, %v1832_v17  ;;  %v1447_v53 = vld [vmem:[#allocation2 + $0x90] sm:$0xff]  ;;  %v3293_v12 = vld [vmem:[#allocation27_spill] sm:$0xff] }
  0x8e   :  { %v1185_v30 = vadd.f32 %v3286_v60, %v991_v33  ;;  %v1316_v41 = vmul.f32 %v1831_v14, %v2428_v63  ;;  %v348_v28 = vmul.f32 %v1443_v44, %v2368_v31  ;;  %v992_v54 = vadd.f32 %v928_v59, %v798_v55  ;;  %v3294_v59 = vld [vmem:[#allocation24_spill] sm:$0xff] }
  0x8f   :  { %2024 = vst [vmem:[#allocation8 + $0x18] sm:$0xff] %v1960_v9  ;;  %v1767_v23 = vadd.f32 %v3287_v2, %v1573_v4  ;;  %v799_v18 = vadd.f32 %v735_v26, %v605_v21  ;;  %v929_v62 = vmul.f32 %v1444_v10, %v2394_v48  ;;  %v1511_v45 = vmul.f32 %v2439_v19, %v1445_v13  ;;  %v1835_v26 = vld [vmem:[#allocation2 + $0x92] sm:$0xff] }
  0x90   :  { %v1379_v24 = vadd.f32 %v1315_v51, %v1185_v30  ;;  %v606_v7 = vadd.f32 %v3288_v25, %v348_v28  ;;  %v736_v16 = vmul.f32 %v1831_v14, %v2387_v43  ;;  %v1186_v29 = vadd.f32 %v3289_v3, %v992_v54  ;;  %v1448_v30 = vld [vmem:[#allocation2 + $0x98] sm:$0xff] }
  0x91   :  { %v1961_v50 = vadd.f32 %v1897_v8, %v1767_v23  ;;  %v1899_v1 = vmul.f32 %v2471_v34, %v1833_v39  ;;  %v993_v44 = vadd.f32 %v929_v62, %v799_v18  ;;  %v930_v47 = vmul.f32 %v1445_v13, %v2394_v48  ;;  %v1834_v8 = vld [vmem:[#allocation2 + $0x82] sm:$0xff]  ;;  %v3296_v23 = vld [vmem:[#allocation26_spill] sm:$0xff] }
  0x92   :  { %v1574_v42 = vadd.f32 %v1510_v5, %v1379_v24  ;;  %v800_v46 = vadd.f32 %v736_v16, %v606_v7  ;;  %v349_v58 = vmul.f32 %v1444_v10, %v2368_v31  ;;  %v1380_v37 = vadd.f32 %v1316_v41, %v1186_v29  ;;  %v3295_v41 = vld [vmem:[#allocation18_spill] sm:$0xff]  ;;  %v3297_v24 = vld [vmem:[#allocation29_spill] sm:$0xff]  ;;  %v3298_v29 = vld [vmem:[#allocation28_spill] sm:$0xff] }
  0x93   :  { %2025 = vst [vmem:[#allocation8 + $0x20] sm:$0xff] %v1961_v50  ;;  %v1187_v38 = vadd.f32 %v3290_v0, %v993_v44  ;;  %v1317_v35 = vmul.f32 %v1832_v17, %v2428_v63  ;;  %v1512_v14 = vmul.f32 %v2439_v19, %v1446_v6  ;;  %v737_v51 = vmul.f32 %v1832_v17, %v2387_v43 }
  0x94   :  { %v1768_v11 = vadd.f32 %v3291_v40, %v1574_v42  ;;  %v994_v22 = vadd.f32 %v930_v47, %v800_v46  ;;  %v607_v15 = vadd.f32 %v3292_v57, %v349_v58  ;;  %v1575_v20 = vadd.f32 %v1511_v45, %v1380_v37  ;;  %v1836_v42 = vld [vmem:[#allocation2 + $0x9a] sm:$0xff]  ;;  %v1449_v47 = vld [vmem:[#allocation2 + $0xa8] sm:$0xff] }
  0x95   :  { %v1381_v56 = vadd.f32 %v1317_v35, %v1187_v38  ;;  %v1318_v10 = vmul.f32 %v1833_v39, %v2428_v63  ;;  %v931_v61 = vmul.f32 %v1446_v6, %v2394_v48  ;;  %v350_v5 = vmul.f32 %v1445_v13, %v2368_v31  ;;  %v3299_v58 = vld [vmem:[#allocation33_spill] sm:$0xff]  ;;  %v3302_v57 = vld [vmem:[#allocation31_spill] sm:$0xff] }
  0x96   :  { %v1962_v27 = vadd.f32 %v1898_v52, %v1768_v11  ;;  %v1188_v9 = vadd.f32 %v3293_v12, %v994_v22  ;;  %v801_v33 = vadd.f32 %v737_v51, %v607_v15  ;;  %v1769_v4 = vadd.f32 %v3294_v59, %v1575_v20  ;;  %v3301_v40 = vld [vmem:[#allocation13_spill] sm:$0xff]  ;;  %v481_v20 = vld [vmem:[#allocation2 + $0x99] sm:$0xff]  ;;  %v3303_v12 = vld [vmem:[#allocation30_spill] sm:$0xff] }
  0x97   :  { %v1576_v55 = vadd.f32 %v1512_v14, %v1381_v56  ;;  %v1900_v49 = vmul.f32 %v2471_v34, %v1834_v8  ;;  %v1513_v21 = vmul.f32 %v2439_v19, %v1447_v53  ;;  %v608_v28 = vadd.f32 %v3295_v41, %v350_v5  ;;  %v3300_v14 = vld [vmem:[#allocation12_spill] sm:$0xff]  ;;  %v1450_v59 = vld [vmem:[#allocation2 + $0xb0] sm:$0xff] }
  0x98   :  { %2026 = vst [vmem:[#allocation8 + $0x28] sm:$0xff] %v1962_v27  ;;  %v1382_v17 = vadd.f32 %v1318_v10, %v1188_v9  ;;  %v995_v60 = vadd.f32 %v931_v61, %v801_v33  ;;  %v738_v52 = vmul.f32 %v1833_v39, %v2387_v43  ;;  %v1963_v2 = vadd.f32 %v1899_v1, %v1769_v4  ;;  %v2706_v4 = vld [vmem:[#allocation2 + $0xb2] sm:$0xff] }
  0x99   :  { %v1770_v54 = vadd.f32 %v3296_v23, %v1576_v55  ;;  %v1319_v13 = vmul.f32 %v1834_v8, %v2428_v63  ;;  %v932_v18 = vmul.f32 %v1447_v53, %v2394_v48  ;;  %v351_v7 = vmul.f32 %v1446_v6, %v2368_v31  ;;  %v1837_v6 = vld [vmem:[#allocation2 + $0xaa] sm:$0xff] }
  0x9a   :  { %v1577_v62 = vadd.f32 %v1513_v21, %v1382_v17  ;;  %v1189_v45 = vadd.f32 %v3297_v24, %v995_v60  ;;  %v802_v25 = vadd.f32 %v738_v52, %v608_v28  ;;  %2027 = vst [vmem:[#allocation8 + $0x30] sm:$0xff] %v1963_v2  ;;  %v1901_v50 = vmul.f32 %v2471_v34, %v1835_v26  ;;  %v1451_v52 = vld [vmem:[#allocation2 + $0xc0] sm:$0xff] }
  0x9b   :  { %v1964_v16 = vadd.f32 %v1900_v49, %v1770_v54  ;;  %v1514_v3 = vmul.f32 %v2439_v19, %v1448_v30  ;;  %v739_v39 = vmul.f32 %v1834_v8, %v2387_v43  ;;  %v609_v37 = vadd.f32 %v3299_v58, %v351_v7  ;;  %v1645_v7 = vld [vmem:[#allocation2 + $0xc1] sm:$0xff] }
  0x9c   :  { %v1771_v1 = vadd.f32 %v3298_v29, %v1577_v62  ;;  %v1383_v44 = vadd.f32 %v1319_v13, %v1189_v45  ;;  %v996_v46 = vadd.f32 %v932_v18, %v802_v25  ;;  %v1320_v0 = vmul.f32 %v1835_v26, %v2428_v63  ;;  %v482_v18 = vld [vmem:[#allocation2 + $0xa9] sm:$0xff]  ;;  %v3305_v62 = vld [vmem:[#allocation32_spill] sm:$0xff] }
  0x9d   :  { %2028 = vst [vmem:[#allocation8 + $0x38] sm:$0xff] %v1964_v16  ;;  %v933_v38 = vmul.f32 %v1448_v30, %v2394_v48  ;;  %v352_v35 = vmul.f32 %v1447_v53, %v2368_v31  ;;  %v1128_v11 = vmul.f32 %v3301_v40, %v3300_v14  ;;  %v803_v51 = vadd.f32 %v739_v39, %v609_v37  ;;  %v1063_v16 = vld [vmem:[#allocation2 + $0xb1] sm:$0xff]  ;;  %v1839_v39 = vld [vmem:[#allocation2 + $0xc2] sm:$0xff] }
  0x9e   :  { %v1965_v8 = vadd.f32 %v1901_v50, %v1771_v1  ;;  %v1578_v22 = vadd.f32 %v1514_v3, %v1383_v44  ;;  %v1190_v15 = vadd.f32 %v3302_v57, %v996_v46  ;;  %v1902_v56 = vmul.f32 %v2471_v34, %v1836_v42  ;;  %v1452_v46 = vld [vmem:[#allocation2 + $0xc8] sm:$0xff] }
  0x9f   :  { %v1515_v10 = vmul.f32 %v2439_v19, %v1449_v47  ;;  %v610_v61 = vadd.f32 %v2635_v36, %v352_v35  ;;  %v740_v27 = vmul.f32 %v1835_v26, %v2387_v43  ;;  %v1903_v33 = vmul.f32 %v2471_v34, %v1837_v6  ;;  %v3304_v26 = vld [vmem:[#allocation34_spill] sm:$0xff] }
  0xa0   :  { %2029 = vst [vmem:[#allocation8 + $0x40] sm:$0xff] %v1965_v8  ;;  %v1772_v53 = vadd.f32 %v3303_v12, %v1578_v22  ;;  %v1384_v9 = vadd.f32 %v1320_v0, %v1190_v15  ;;  %v997_v5 = vadd.f32 %v933_v38, %v803_v51  ;;  %v934_v49 = vmul.f32 %v1449_v47, %v2394_v48  ;;  %v3306_v38 = vld [vmem:[#allocation19_spill] sm:$0xff]  ;;  %v1646_v15 = vld [vmem:[#allocation2 + $0xc9] sm:$0xff] }
  0xa1   :  { %v804_v55 = vadd.f32 %v740_v27, %v610_v61  ;;  %v353_v21 = vmul.f32 %v1448_v30, %v2368_v31  ;;  %v547_v17 = vmul.f32 %v2371_v32, %v481_v20  ;;  %v1321_v28 = vmul.f32 %v1836_v42, %v2428_v63  ;;  %v1840_v27 = vld [vmem:[#allocation2 + $0xca] sm:$0xff] }
  0xa2   :  { %v1966_v36 = vadd.f32 %v1902_v56, %v1772_v53  ;;  %v1579_v60 = vadd.f32 %v1515_v10, %v1384_v9  ;;  %v1191_v41 = vadd.f32 %v3304_v26, %v997_v5  ;;  %v1516_v2 = vmul.f32 %v2439_v19, %v1450_v59 }
  0xa3   :  { %v998_v23 = vadd.f32 %v934_v49, %v804_v55  ;;  %v611_v54 = vadd.f32 %v547_v17, %v353_v21  ;;  %v741_v13 = vmul.f32 %v1836_v42, %v2387_v43  ;;  %v1904_v45 = vmul.f32 %v2471_v34, %v2706_v4  ;;  %v1453_v21 = vld [vmem:[#allocation2 + $0xd8] sm:$0xff] }
  0xa4   :  { %2030 = vst [vmem:[#allocation8 + $0x48] sm:$0xff] %v1966_v36  ;;  %v1773_v24 = vadd.f32 %v3305_v62, %v1579_v60  ;;  %v1385_v30 = vadd.f32 %v1321_v28, %v1191_v41  ;;  %v1322_v25 = vmul.f32 %v1837_v6, %v2428_v63  ;;  %v1517_v3 = vmul.f32 %v2439_v19, %v1451_v52 }
  0xa5   :  { %v1192_v50 = vadd.f32 %v1128_v11, %v998_v23  ;;  %v805_v29 = vadd.f32 %v741_v13, %v611_v54  ;;  %v935_v1 = vmul.f32 %v1450_v59, %v2394_v48  ;;  %v354_v58 = vmul.f32 %v1449_v47, %v2368_v31  ;;  %v3307_v11 = vld [vmem:[#allocation35_spill] sm:$0xff] }
  0xa6   :  { %v1967_v44 = vadd.f32 %v1903_v33, %v1773_v24  ;;  %v1580_v42 = vadd.f32 %v1516_v2, %v1385_v30  ;;  %v548_v37 = vmul.f32 %v2371_v32, %v482_v18  ;;  %v1711_v35 = vmul.f32 %v3306_v38, %v1645_v7  ;;  %v1841_v23 = vld [vmem:[#allocation2 + $0xda] sm:$0xff] }
  0xa7   :  { %v1386_v0 = vadd.f32 %v1322_v25, %v1192_v50  ;;  %v999_v14 = vadd.f32 %v935_v1, %v805_v29  ;;  %v1129_v8 = vmul.f32 %v3301_v40, %v1063_v16  ;;  %v1905_v57 = vmul.f32 %v2471_v34, %v1839_v39  ;;  %v2744_v50 = vld [vmem:[#allocation2 + $0xe1] sm:$0xff] }
  0xa8   :  { %2031 = vst [vmem:[#allocation8 + $0x50] sm:$0xff] %v1967_v44  ;;  %v1774_v22 = vadd.f32 %v3307_v11, %v1580_v42  ;;  %v612_v51 = vadd.f32 %v548_v37, %v354_v58  ;;  %v742_v20 = vmul.f32 %v1837_v6, %v2387_v43  ;;  %v1323_v47 = vmul.f32 %v2706_v4, %v2428_v63  ;;  %v1647_v6 = vld [vmem:[#allocation2 + $0xd9] sm:$0xff] }
  0xa9   :  { %v1581_v56 = vadd.f32 %v1517_v3, %v1386_v0  ;;  %v1193_v10 = vadd.f32 %v1129_v8, %v999_v14  ;;  %v1518_v61 = vmul.f32 %v2439_v19, %v1452_v46  ;;  %v936_v9 = vmul.f32 %v1451_v52, %v2394_v48 }
  0xaa   :  { %v1968_v12 = vadd.f32 %v1904_v45, %v1774_v22  ;;  %v806_v53 = vadd.f32 %v742_v20, %v612_v51  ;;  %v355_v33 = vmul.f32 %v1450_v59, %v2368_v31  ;;  %v1712_v49 = vmul.f32 %v3306_v38, %v1646_v15  ;;  %v1455_v51 = vld [vmem:[#allocation2 + $0xf0] sm:$0xff] }
  0xab   :  { %v1775_v5 = vadd.f32 %v1711_v35, %v1581_v56  ;;  %v1387_v55 = vadd.f32 %v1323_v47, %v1193_v10  ;;  %v549_v17 = vmul.f32 %v1063_v16, %v2371_v32  ;;  %v1906_v36 = vmul.f32 %v2471_v34, %v1840_v27  ;;  %v1454_v16 = vld [vmem:[#allocation2 + $0xe0] sm:$0xff] }
  0xac   :  { %2032 = vst [vmem:[#allocation8 + $0x58] sm:$0xff] %v1968_v12  ;;  %v1000_v60 = vadd.f32 %v936_v9, %v806_v53  ;;  %v1130_v26 = vmul.f32 %v1645_v7, %v3301_v40  ;;  %v1324_v41 = vmul.f32 %v1839_v39, %v2428_v63  ;;  %v743_v54 = vmul.f32 %v2706_v4, %v2387_v43  ;;  %v1649_v53 = vld [vmem:[#allocation2 + $0xf1] sm:$0xff] }
  0xad   :  { %v1969_v28 = vadd.f32 %v1905_v57, %v1775_v5  ;;  %v1582_v2 = vadd.f32 %v1518_v61, %v1387_v55  ;;  %v613_v59 = vadd.f32 %v549_v17, %v355_v33  ;;  %v1519_v18 = vmul.f32 %v2439_v19, %v1453_v21 }
  0xae   :  { %v1194_v13 = vadd.f32 %v1130_v26, %v1000_v60  ;;  %v1713_v62 = vmul.f32 %v3306_v38, %v1647_v6  ;;  %v356_v24 = vmul.f32 %v1451_v52, %v2368_v31  ;;  %v937_v25 = vmul.f32 %v1452_v46, %v2394_v48  ;;  %v2750_v52 = vld [vmem:[#allocation2 + $0xe2] sm:$0xff]  ;;  %v1456_v26 = vld [vmem:[#allocation2 + $0xf8] sm:$0xff] }
  0xaf   :  { %2033 = vst [vmem:[#allocation8 + $0x60] sm:$0xff] %v1969_v28  ;;  %v1776_v30 = vadd.f32 %v1712_v49, %v1582_v2  ;;  %v807_v45 = vadd.f32 %v743_v54, %v613_v59  ;;  %v550_v3 = vmul.f32 %v1645_v7, %v2371_v32  ;;  %v1907_v4 = vmul.f32 %v2471_v34, %v1841_v23 }
  0xb0   :  { %v1388_v29 = vadd.f32 %v1324_v41, %v1194_v13  ;;  %v1131_v1 = vmul.f32 %v1646_v15, %v3301_v40  ;;  %v1325_v44 = vmul.f32 %v1840_v27, %v2428_v63  ;;  %v744_v0 = vmul.f32 %v1839_v39, %v2387_v43 }
  0xb1   :  { %v1970_v42 = vadd.f32 %v1906_v36, %v1776_v30  ;;  %v1001_v58 = vadd.f32 %v937_v25, %v807_v45  ;;  %v614_v37 = vadd.f32 %v550_v3, %v356_v24  ;;  %v1520_v14 = vmul.f32 %v2439_v19, %v1454_v16 }
  0xb2   :  { %v1583_v35 = vadd.f32 %v1519_v18, %v1388_v29  ;;  %v1714_v7 = vmul.f32 %v3306_v38, %v2744_v50  ;;  %v357_v8 = vmul.f32 %v1452_v46, %v2368_v31  ;;  %v938_v57 = vmul.f32 %v1453_v21, %v2394_v48  ;;  %v2763_v46 = vld [vmem:[#allocation2 + $0xf2] sm:$0xff] }
  0xb3   :  { %2034 = vst [vmem:[#allocation8 + $0x68] sm:$0xff] %v1970_v42  ;;  %v1195_v11 = vadd.f32 %v1131_v1, %v1001_v58  ;;  %v808_v22 = vadd.f32 %v744_v0, %v614_v37  ;;  %v551_v20 = vmul.f32 %v1646_v15, %v2371_v32  ;;  %v1908_v39 = vmul.f32 %v2471_v34, %v2750_v52  ;;  %v1650_v18 = vld [vmem:[#allocation2 + $0xf9] sm:$0xff]  ;;  %v1457_v1 = vld [vmem:[#allocation2 + $0x108] sm:$0xff] }
  0xb4   :  { %v1777_v56 = vadd.f32 %v1713_v62, %v1583_v35  ;;  %v1132_v10 = vmul.f32 %v1647_v6, %v3301_v40  ;;  %v1326_v47 = vmul.f32 %v1841_v23, %v2428_v63  ;;  %v745_v33 = vmul.f32 %v1840_v27, %v2387_v43  ;;  %v2776_v62 = vld [vmem:[#allocation2 + $0xfa] sm:$0xff] }
  0xb5   :  { %v1389_v61 = vadd.f32 %v1325_v44, %v1195_v11  ;;  %v1002_v12 = vadd.f32 %v938_v57, %v808_v22  ;;  %v615_v9 = vadd.f32 %v551_v20, %v357_v8  ;;  %v1521_v55 = vmul.f32 %v2439_v19, %v1455_v51  ;;  %v2783_v44 = vld [vmem:[#allocation2 + $0x109] sm:$0xff] }
  0xb6   :  { %v1971_v5 = vadd.f32 %v1907_v4, %v1777_v56  ;;  %v939_v15 = vmul.f32 %v1454_v16, %v2394_v48  ;;  %v358_v49 = vmul.f32 %v1453_v21, %v2368_v31  ;;  %v552_v41 = vmul.f32 %v1647_v6, %v2371_v32  ;;  %v1845_v8 = vld [vmem:[#allocation2 + $0x10a] sm:$0xff] }
  0xb7   :  { %v1584_v17 = vadd.f32 %v1520_v14, %v1389_v61  ;;  %v1196_v36 = vadd.f32 %v1132_v10, %v1002_v12  ;;  %v809_v60 = vadd.f32 %v745_v33, %v615_v9  ;;  %v1715_v28 = vmul.f32 %v3306_v38, %v1649_v53  ;;  %v1458_v10 = vld [vmem:[#allocation2 + $0x110] sm:$0xff] }
  0xb8   :  { %2035 = vst [vmem:[#allocation8 + $0x70] sm:$0xff] %v1971_v5  ;;  %v1909_v2 = vmul.f32 %v2471_v34, %v2763_v46  ;;  %v1133_v27 = vmul.f32 %v2744_v50, %v3301_v40  ;;  %v746_v59 = vmul.f32 %v1841_v23, %v2387_v43  ;;  %v616_v24 = vadd.f32 %v552_v41, %v358_v49  ;;  %v2801_v33 = vld [vmem:[#allocation2 + $0x111] sm:$0xff] }
  0xb9   :  { %v1778_v54 = vadd.f32 %v1714_v7, %v1584_v17  ;;  %v1390_v13 = vadd.f32 %v1326_v47, %v1196_v36  ;;  %v1003_v21 = vadd.f32 %v939_v15, %v809_v60  ;;  %v1327_v6 = vmul.f32 %v2750_v52, %v2428_v63  ;;  %v2808_v36 = vld [vmem:[#allocation2 + $0x112] sm:$0xff] }
  0xba   :  { %v1522_v30 = vmul.f32 %v2439_v19, %v1456_v26  ;;  %v940_v45 = vmul.f32 %v1455_v51, %v2394_v48  ;;  %v359_v25 = vmul.f32 %v1454_v16, %v2368_v31  ;;  %v810_v23 = vadd.f32 %v746_v59, %v616_v24 }
  0xbb   :  { %v1972_v3 = vadd.f32 %v1908_v39, %v1778_v54  ;;  %v1585_v29 = vadd.f32 %v1521_v55, %v1390_v13  ;;  %v1197_v4 = vadd.f32 %v1133_v27, %v1003_v21  ;;  %v1716_v42 = vmul.f32 %v3306_v38, %v1650_v18  ;;  %v1459_v21 = vld [vmem:[#allocation2 + $0x120] sm:$0xff] }
  0xbc   :  { %v1910_v58 = vmul.f32 %v2471_v34, %v2776_v62  ;;  %v1134_v37 = vmul.f32 %v1649_v53, %v3301_v40  ;;  %v553_v0 = vmul.f32 %v2744_v50, %v2371_v32  ;;  %v1004_v14 = vadd.f32 %v940_v45, %v810_v23 }
  0xbd   :  { %2036 = vst [vmem:[#allocation8 + $0x78] sm:$0xff] %v1972_v3  ;;  %v1779_v35 = vadd.f32 %v1715_v28, %v1585_v29  ;;  %v1391_v16 = vadd.f32 %v1327_v6, %v1197_v4  ;;  %v1328_v7 = vmul.f32 %v2763_v46, %v2428_v63  ;;  %v1523_v11 = vmul.f32 %v2439_v19, %v1457_v1  ;;  %v2822_v29 = vld [vmem:[#allocation2 + $0x122] sm:$0xff] }
  0xbe   :  { %v1717_v22 = vmul.f32 %v3306_v38, %v2783_v44  ;;  %v617_v57 = vadd.f32 %v553_v0, %v359_v25  ;;  %v747_v20 = vmul.f32 %v2750_v52, %v2387_v43  ;;  %v1198_v50 = vadd.f32 %v1134_v37, %v1004_v14  ;;  %v1460_v14 = vld [vmem:[#allocation2 + $0x128] sm:$0xff] }
  0xbf   :  { %v1973_v56 = vadd.f32 %v1909_v2, %v1779_v35  ;;  %v1586_v39 = vadd.f32 %v1522_v30, %v1391_v16  ;;  %v360_v47 = vmul.f32 %v1455_v51, %v2368_v31  ;;  %v1911_v61 = vmul.f32 %v2471_v34, %v1845_v8 }
  0xc0   :  { %v811_v12 = vadd.f32 %v747_v20, %v617_v57  ;;  %v941_v9 = vmul.f32 %v1456_v26, %v2394_v48  ;;  %v554_v5 = vmul.f32 %v1649_v53, %v2371_v32  ;;  %v1392_v15 = vadd.f32 %v1328_v7, %v1198_v50  ;;  %v2837_v50 = vld [vmem:[#allocation2 + $0x12a] sm:$0xff] }
  0xc1   :  { %2037 = vst [vmem:[#allocation8 + $0x80] sm:$0xff] %v1973_v56  ;;  %v1780_v55 = vadd.f32 %v1716_v42, %v1586_v39  ;;  %v1135_v52 = vmul.f32 %v1650_v18, %v3301_v40  ;;  %v1329_v49 = vmul.f32 %v2776_v62, %v2428_v63  ;;  %v1524_v51 = vmul.f32 %v2439_v19, %v1458_v10  ;;  %v1654_v39 = vld [vmem:[#allocation2 + $0x129] sm:$0xff] }
  0xc2   :  { %v1005_v17 = vadd.f32 %v941_v9, %v811_v12  ;;  %v618_v60 = vadd.f32 %v554_v5, %v360_v47  ;;  %v748_v41 = vmul.f32 %v2763_v46, %v2387_v43  ;;  %v1587_v2 = vadd.f32 %v1523_v11, %v1392_v15 }
  0xc3   :  { %v1974_v28 = vadd.f32 %v1910_v58, %v1780_v55  ;;  %v1718_v53 = vmul.f32 %v3306_v38, %v2801_v33  ;;  %v361_v27 = vmul.f32 %v1456_v26, %v2368_v31  ;;  %v942_v13 = vmul.f32 %v1457_v1, %v2394_v48  ;;  %v1653_v26 = vld [vmem:[#allocation2 + $0x121] sm:$0xff] }
  0xc4   :  { %v1199_v59 = vadd.f32 %v1135_v52, %v1005_v17  ;;  %v812_v54 = vadd.f32 %v748_v41, %v618_v60  ;;  %v555_v24 = vmul.f32 %v1650_v18, %v2371_v32  ;;  %v1781_v6 = vadd.f32 %v1717_v22, %v1587_v2  ;;  %v1461_v52 = vld [vmem:[#allocation2 + $0x138] sm:$0xff] }
  0xc5   :  { %2038 = vst [vmem:[#allocation8 + $0x88] sm:$0xff] %v1974_v28  ;;  %v1912_v30 = vmul.f32 %v2471_v34, %v2808_v36  ;;  %v1136_v46 = vmul.f32 %v2783_v44, %v3301_v40  ;;  %v1330_v45 = vmul.f32 %v1845_v8, %v2428_v63  ;;  %v749_v23 = vmul.f32 %v2776_v62, %v2387_v43 }
  0xc6   :  { %v1393_v25 = vadd.f32 %v1329_v49, %v1199_v59  ;;  %v1006_v3 = vadd.f32 %v942_v13, %v812_v54  ;;  %v619_v4 = vadd.f32 %v555_v24, %v361_v27  ;;  %v1975_v18 = vadd.f32 %v1911_v61, %v1781_v6  ;;  %v2844_v49 = vld [vmem:[#allocation2 + $0x139] sm:$0xff] }
  0xc7   :  { %v1525_v42 = vmul.f32 %v2439_v19, %v1459_v21  ;;  %v943_v58 = vmul.f32 %v1458_v10, %v2394_v48  ;;  %v362_v37 = vmul.f32 %v1457_v1, %v2368_v31  ;;  %v556_v7 = vmul.f32 %v2783_v44, %v2371_v32  ;;  %v1849_v27 = vld [vmem:[#allocation2 + $0x13a] sm:$0xff] }
  0xc8   :  { %v1588_v0 = vadd.f32 %v1524_v51, %v1393_v25  ;;  %v1200_v35 = vadd.f32 %v1136_v46, %v1006_v3  ;;  %v813_v16 = vadd.f32 %v749_v23, %v619_v4  ;;  %2039 = vst [vmem:[#allocation8 + $0x90] sm:$0xff] %v1975_v18  ;;  %v1719_v11 = vmul.f32 %v3306_v38, %v1653_v26  ;;  %v1462_v46 = vld [vmem:[#allocation2 + $0x140] sm:$0xff] }
  0xc9   :  { %v1913_v62 = vmul.f32 %v2471_v34, %v2822_v29  ;;  %v1137_v22 = vmul.f32 %v2801_v33, %v3301_v40  ;;  %v750_v57 = vmul.f32 %v1845_v8, %v2387_v43  ;;  %v620_v47 = vadd.f32 %v556_v7, %v362_v37  ;;  %v2862_v23 = vld [vmem:[#allocation2 + $0x141] sm:$0xff] }
  0xca   :  { %v1782_v20 = vadd.f32 %v1718_v53, %v1588_v0  ;;  %v1394_v1 = vadd.f32 %v1330_v45, %v1200_v35  ;;  %v1007_v56 = vadd.f32 %v943_v58, %v813_v16  ;;  %v1331_v44 = vmul.f32 %v2808_v36, %v2428_v63  ;;  %v2869_v35 = vld [vmem:[#allocation2 + $0x142] sm:$0xff] }
  0xcb   :  { %v1526_v61 = vmul.f32 %v2439_v19, %v1460_v14  ;;  %v944_v12 = vmul.f32 %v1459_v21, %v2394_v48  ;;  %v363_v9 = vmul.f32 %v1458_v10, %v2368_v31  ;;  %v814_v8 = vadd.f32 %v750_v57, %v620_v47 }
  0xcc   :  { %v1976_v5 = vadd.f32 %v1912_v30, %v1782_v20  ;;  %v1589_v55 = vadd.f32 %v1525_v42, %v1394_v1  ;;  %v1201_v15 = vadd.f32 %v1137_v22, %v1007_v56  ;;  %v1720_v17 = vmul.f32 %v3306_v38, %v1654_v39  ;;  %v1463_v56 = vld [vmem:[#allocation2 + $0x150] sm:$0xff] }
  0xcd   :  { %v1914_v51 = vmul.f32 %v2471_v34, %v2837_v50  ;;  %v1138_v60 = vmul.f32 %v1653_v26, %v3301_v40  ;;  %v557_v41 = vmul.f32 %v2801_v33, %v2371_v32  ;;  %v1008_v2 = vadd.f32 %v944_v12, %v814_v8 }
  0xce   :  { %2040 = vst [vmem:[#allocation8 + $0x98] sm:$0xff] %v1976_v5  ;;  %v1783_v28 = vadd.f32 %v1719_v11, %v1589_v55  ;;  %v1395_v10 = vadd.f32 %v1331_v44, %v1201_v15  ;;  %v1332_v53 = vmul.f32 %v2822_v29, %v2428_v63  ;;  %v1527_v59 = vmul.f32 %v2439_v19, %v1461_v52  ;;  %v2883_v55 = vld [vmem:[#allocation2 + $0x152] sm:$0xff] }
  0xcf   :  { %v1721_v54 = vmul.f32 %v3306_v38, %v2844_v49  ;;  %v621_v13 = vadd.f32 %v557_v41, %v363_v9  ;;  %v751_v24 = vmul.f32 %v2808_v36, %v2387_v43  ;;  %v1202_v33 = vadd.f32 %v1138_v60, %v1008_v2  ;;  %v1464_v2 = vld [vmem:[#allocation2 + $0x158] sm:$0xff] }
  0xd0   :  { %v1977_v6 = vadd.f32 %v1913_v62, %v1783_v28  ;;  %v1590_v30 = vadd.f32 %v1526_v61, %v1395_v10  ;;  %v364_v45 = vmul.f32 %v1459_v21, %v2368_v31  ;;  %v1915_v25 = vmul.f32 %v2471_v34, %v1849_v27 }
  0xd1   :  { %v815_v3 = vadd.f32 %v751_v24, %v621_v13  ;;  %v945_v4 = vmul.f32 %v1460_v14, %v2394_v48  ;;  %v558_v18 = vmul.f32 %v1653_v26, %v2371_v32  ;;  %v1396_v58 = vadd.f32 %v1332_v53, %v1202_v33  ;;  %v2898_v33 = vld [vmem:[#allocation2 + $0x15a] sm:$0xff] }
  0xd2   :  { %2041 = vst [vmem:[#allocation8 + $0xa0] sm:$0xff] %v1977_v6  ;;  %v1784_v42 = vadd.f32 %v1720_v17, %v1590_v30  ;;  %v1139_v36 = vmul.f32 %v1654_v39, %v3301_v40  ;;  %v1333_v37 = vmul.f32 %v2837_v50, %v2428_v63  ;;  %v1528_v21 = vmul.f32 %v2439_v19, %v1462_v46  ;;  %v1658_v30 = vld [vmem:[#allocation2 + $0x159] sm:$0xff] }
  0xd3   :  { %v1009_v0 = vadd.f32 %v945_v4, %v815_v3  ;;  %v622_v16 = vadd.f32 %v558_v18, %v364_v45  ;;  %v752_v7 = vmul.f32 %v2822_v29, %v2387_v43  ;;  %v1591_v62 = vadd.f32 %v1527_v59, %v1396_v58 }
  0xd4   :  { %v1978_v11 = vadd.f32 %v1914_v51, %v1784_v42  ;;  %v1722_v26 = vmul.f32 %v3306_v38, %v2862_v23  ;;  %v365_v22 = vmul.f32 %v1460_v14, %v2368_v31  ;;  %v946_v1 = vmul.f32 %v1461_v52, %v2394_v48  ;;  %v1657_v14 = vld [vmem:[#allocation2 + $0x151] sm:$0xff] }
  0xd5   :  { %v1203_v57 = vadd.f32 %v1139_v36, %v1009_v0  ;;  %v816_v20 = vadd.f32 %v752_v7, %v622_v16  ;;  %v559_v47 = vmul.f32 %v1654_v39, %v2371_v32  ;;  %v1785_v44 = vadd.f32 %v1721_v54, %v1591_v62  ;;  %v1465_v36 = vld [vmem:[#allocation2 + $0x168] sm:$0xff] }
  0xd6   :  { %2042 = vst [vmem:[#allocation8 + $0xa8] sm:$0xff] %v1978_v11  ;;  %v1916_v61 = vmul.f32 %v2471_v34, %v2869_v35  ;;  %v1140_v29 = vmul.f32 %v2844_v49, %v3301_v40  ;;  %v1334_v12 = vmul.f32 %v1849_v27, %v2428_v63  ;;  %v753_v8 = vmul.f32 %v2837_v50, %v2387_v43 }
  0xd7   :  { %v1397_v9 = vadd.f32 %v1333_v37, %v1203_v57  ;;  %v1010_v5 = vadd.f32 %v946_v1, %v816_v20  ;;  %v623_v15 = vadd.f32 %v559_v47, %v365_v22  ;;  %v1979_v39 = vadd.f32 %v1915_v25, %v1785_v44  ;;  %v2905_v37 = vld [vmem:[#allocation2 + $0x169] sm:$0xff] }
  0xd8   :  { %v1529_v17 = vmul.f32 %v2439_v19, %v1463_v56  ;;  %v947_v51 = vmul.f32 %v1462_v46, %v2394_v48  ;;  %v366_v60 = vmul.f32 %v1461_v52, %v2368_v31  ;;  %v560_v53 = vmul.f32 %v2844_v49, %v2371_v32  ;;  %v1853_v22 = vld [vmem:[#allocation2 + $0x16a] sm:$0xff] }
  0xd9   :  { %v1592_v41 = vadd.f32 %v1528_v21, %v1397_v9  ;;  %v1204_v28 = vadd.f32 %v1140_v29, %v1010_v5  ;;  %v817_v10 = vadd.f32 %v753_v8, %v623_v15  ;;  %2043 = vst [vmem:[#allocation8 + $0xb0] sm:$0xff] %v1979_v39  ;;  %v1723_v59 = vmul.f32 %v3306_v38, %v1657_v14  ;;  %v1466_v29 = vld [vmem:[#allocation2 + $0x170] sm:$0xff] }
  0xda   :  { %v1917_v50 = vmul.f32 %v2471_v34, %v2883_v55  ;;  %v1141_v54 = vmul.f32 %v2862_v23, %v3301_v40  ;;  %v754_v13 = vmul.f32 %v1849_v27, %v2387_v43  ;;  %v624_v45 = vadd.f32 %v560_v53, %v366_v60  ;;  %v2923_v8 = vld [vmem:[#allocation2 + $0x171] sm:$0xff] }
  0xdb   :  { %v1786_v24 = vadd.f32 %v1722_v26, %v1592_v41  ;;  %v1398_v52 = vadd.f32 %v1334_v12, %v1204_v28  ;;  %v1011_v6 = vadd.f32 %v947_v51, %v817_v10  ;;  %v1335_v49 = vmul.f32 %v2869_v35, %v2428_v63  ;;  %v2930_v28 = vld [vmem:[#allocation2 + $0x172] sm:$0xff] }
  0xdc   :  { %v1530_v25 = vmul.f32 %v2439_v19, %v1464_v2  ;;  %v948_v3 = vmul.f32 %v1463_v56, %v2394_v48  ;;  %v367_v4 = vmul.f32 %v1462_v46, %v2368_v31  ;;  %v818_v27 = vadd.f32 %v754_v13, %v624_v45 }
  0xdd   :  { %v1980_v18 = vadd.f32 %v1916_v61, %v1786_v24  ;;  %v1593_v42 = vadd.f32 %v1529_v17, %v1398_v52  ;;  %v1205_v58 = vadd.f32 %v1141_v54, %v1011_v6  ;;  %v1724_v0 = vmul.f32 %v3306_v38, %v1658_v30  ;;  %v1467_v6 = vld [vmem:[#allocation2 + $0x180] sm:$0xff] }
  0xde   :  { %v1918_v21 = vmul.f32 %v2471_v34, %v2898_v33  ;;  %v1142_v16 = vmul.f32 %v1657_v14, %v3301_v40  ;;  %v561_v7 = vmul.f32 %v2862_v23, %v2371_v32  ;;  %v1012_v62 = vadd.f32 %v948_v3, %v818_v27 }
  0xdf   :  { %2044 = vst [vmem:[#allocation8 + $0xb8] sm:$0xff] %v1980_v18  ;;  %v1787_v11 = vadd.f32 %v1723_v59, %v1593_v42  ;;  %v1399_v46 = vadd.f32 %v1335_v49, %v1205_v58  ;;  %v1336_v26 = vmul.f32 %v2883_v55, %v2428_v63  ;;  %v1531_v57 = vmul.f32 %v2439_v19, %v1465_v36 }
  0xe0   :  { %v1725_v20 = vmul.f32 %v3306_v38, %v2905_v37  ;;  %v625_v1 = vadd.f32 %v561_v7, %v367_v4  ;;  %v755_v47 = vmul.f32 %v2869_v35, %v2387_v43  ;;  %v1206_v23 = vadd.f32 %v1142_v16, %v1012_v62  ;;  %v1468_v62 = vld [vmem:[#allocation2 + $0x188] sm:$0xff] }
  0xe1   :  { %v1981_v44 = vadd.f32 %v1917_v50, %v1787_v11  ;;  %v1594_v61 = vadd.f32 %v1530_v25, %v1399_v46  ;;  %v368_v12 = vmul.f32 %v1463_v56, %v2368_v31  ;;  %v1919_v9 = vmul.f32 %v2471_v34, %v1853_v22  ;;  %v1855_v11 = vld [vmem:[#allocation2 + $0x182] sm:$0xff] }
  0xe2   :  { %v819_v5 = vadd.f32 %v755_v47, %v625_v1  ;;  %v949_v15 = vmul.f32 %v1464_v2, %v2394_v48  ;;  %v562_v39 = vmul.f32 %v1657_v14, %v2371_v32  ;;  %v1400_v51 = vadd.f32 %v1336_v26, %v1206_v23 }
  0xe3   :  { %2045 = vst [vmem:[#allocation8 + $0xc0] sm:$0xff] %v1981_v44  ;;  %v1788_v17 = vadd.f32 %v1724_v0, %v1594_v61  ;;  %v1143_v35 = vmul.f32 %v1658_v30, %v3301_v40  ;;  %v1337_v60 = vmul.f32 %v2898_v33, %v2428_v63  ;;  %v1532_v56 = vmul.f32 %v2439_v19, %v1466_v29  ;;  %v1662_v61 = vld [vmem:[#allocation2 + $0x189] sm:$0xff] }
  0xe4   :  { %v1013_v41 = vadd.f32 %v949_v15, %v819_v5  ;;  %v626_v10 = vadd.f32 %v562_v39, %v368_v12  ;;  %v756_v53 = vmul.f32 %v2883_v55, %v2387_v43  ;;  %v1595_v50 = vadd.f32 %v1531_v57, %v1400_v51  ;;  %v308_v51 = vld [vmem:[#allocation2 + $0x1c8] sm:$0xff] }
  0xe5   :  { %v1982_v59 = vadd.f32 %v1918_v21, %v1788_v17  ;;  %v1726_v14 = vmul.f32 %v3306_v38, %v2923_v8  ;;  %v369_v54 = vmul.f32 %v1464_v2, %v2368_v31  ;;  %v950_v52 = vmul.f32 %v1465_v36, %v2394_v48  ;;  %v1661_v2 = vld [vmem:[#allocation2 + $0x181] sm:$0xff] }
  0xe6   :  { %v1207_v13 = vadd.f32 %v1143_v35, %v1013_v41  ;;  %v820_v24 = vadd.f32 %v756_v53, %v626_v10  ;;  %v563_v45 = vmul.f32 %v1658_v30, %v2371_v32  ;;  %v1789_v49 = vadd.f32 %v1725_v20, %v1595_v50  ;;  %v502_v10 = vld [vmem:[#allocation2 + $0x1c9] sm:$0xff] }
  0xe7   :  { %2046 = vst [vmem:[#allocation8 + $0xc8] sm:$0xff] %v1982_v59  ;;  %v1920_v25 = vmul.f32 %v2471_v34, %v2930_v28  ;;  %v1144_v55 = vmul.f32 %v2905_v37, %v3301_v40  ;;  %v1338_v3 = vmul.f32 %v1853_v22, %v2428_v63  ;;  %v757_v58 = vmul.f32 %v2898_v33, %v2387_v43  ;;  %v1856_v50 = vld [vmem:[#allocation2 + $0x18a] sm:$0xff] }
  0xe8   :  { %v1401_v4 = vadd.f32 %v1337_v60, %v1207_v13  ;;  %v1014_v18 = vadd.f32 %v950_v52, %v820_v24  ;;  %v627_v42 = vadd.f32 %v563_v45, %v369_v54  ;;  %v1983_v27 = vadd.f32 %v1919_v9, %v1789_v49  ;;  %v1663_v13 = vld [vmem:[#allocation2 + $0x199] sm:$0xff]  ;;  %v696_v49 = vld [vmem:[#allocation2 + $0x1ca] sm:$0xff] }
  0xe9   :  { %v1533_v30 = vmul.f32 %v2439_v19, %v1467_v6  ;;  %v951_v0 = vmul.f32 %v1466_v29, %v2394_v48  ;;  %v370_v21 = vmul.f32 %v1465_v36, %v2368_v31  ;;  %v564_v26 = vmul.f32 %v2905_v37, %v2371_v32 }
  0xea   :  { %v1596_v16 = vadd.f32 %v1532_v56, %v1401_v4  ;;  %v1208_v7 = vadd.f32 %v1144_v55, %v1014_v18  ;;  %v821_v46 = vadd.f32 %v757_v58, %v627_v42  ;;  %2047 = vst [vmem:[#allocation8 + $0xd0] sm:$0xff] %v1983_v27  ;;  %v1727_v57 = vmul.f32 %v3306_v38, %v1661_v2  ;;  %v890_v4 = vld [vmem:[#allocation2 + $0x1e0] sm:$0xff]  ;;  %v309_v58 = vld [vmem:[#allocation2 + $0x1d0] sm:$0xff] }
  0xeb   :  { %v1145_v33 = vmul.f32 %v2923_v8, %v3301_v40  ;;  %v758_v20 = vmul.f32 %v1853_v22, %v2387_v43  ;;  %v952_v1 = vmul.f32 %v1467_v6, %v2394_v48  ;;  %v628_v23 = vadd.f32 %v564_v26, %v370_v21  ;;  %v1084_v26 = vld [vmem:[#allocation2 + $0x1e1] sm:$0xff] }
  0xec   :  { %v1790_v47 = vadd.f32 %v1726_v14, %v1596_v16  ;;  %v1402_v36 = vadd.f32 %v1338_v3, %v1208_v7  ;;  %v1015_v44 = vadd.f32 %v951_v0, %v821_v46  ;;  %v1921_v12 = vmul.f32 %v2471_v34, %v1855_v11  ;;  %v2117_v14 = vld [vmem:[#allocation2] sm:$0xff]  ;;  %v503_v16 = vld [vmem:[#allocation2 + $0x1d1] sm:$0xff] }
  0xed   :  { %v1339_v37 = vmul.f32 %v2930_v28, %v2428_v63  ;;  %v1534_v9 = vmul.f32 %v2439_v19, %v1468_v62  ;;  %v371_v5 = vmul.f32 %v1466_v29, %v2368_v31  ;;  %v822_v22 = vadd.f32 %v758_v20, %v628_v23  ;;  %v1664_v46 = vld [vmem:[#allocation2 + $0x1a1] sm:$0xff] }
  0xee   :  { %v1984_v15 = vadd.f32 %v1920_v25, %v1790_v47  ;;  %v1597_v39 = vadd.f32 %v1533_v30, %v1402_v36  ;;  %v1209_v17 = vadd.f32 %v1145_v33, %v1015_v44  ;;  %v1728_v35 = vmul.f32 %v3306_v38, %v1662_v61  ;;  %v1857_v30 = vld [vmem:[#allocation2 + $0x19a] sm:$0xff]  ;;  %v1858_v20 = vld [vmem:[#allocation2 + $0x1a2] sm:$0xff]  ;;  %v697_v36 = vld [vmem:[#allocation2 + $0x1d2] sm:$0xff] }
  0xef   :  { %v1146_v60 = vmul.f32 %v1661_v2, %v3301_v40  ;;  %v1340_v41 = vmul.f32 %v1855_v11, %v2428_v63  ;;  %v565_v56 = vmul.f32 %v2923_v8, %v2371_v32  ;;  %v1016_v29 = vadd.f32 %v952_v1, %v822_v22 }
  0xf0   :  { %2048 = vst [vmem:[#allocation8 + $0xd8] sm:$0xff] %v1984_v15  ;;  %v1791_v53 = vadd.f32 %v1727_v57, %v1597_v39  ;;  %v1403_v59 = vadd.f32 %v1339_v37, %v1209_v17  ;;  %v1535_v54 = vmul.f32 %v2117_v14, %v2439_v19  ;;  %v759_v52 = vmul.f32 %v2930_v28, %v2387_v43  ;;  %v1278_v37 = vld [vmem:[#allocation2 + $0x1e2] sm:$0xff] }
  0xf1   :  { %v629_v24 = vadd.f32 %v565_v56, %v371_v5  ;;  %v953_v6 = vmul.f32 %v1468_v62, %v2394_v48  ;;  %v374_v45 = vmul.f32 %v2368_v31, %v308_v51  ;;  %v1210_v55 = vadd.f32 %v1146_v60, %v1016_v29  ;;  %v891_v17 = vld [vmem:[#allocation2 + $0x1e8] sm:$0xff]  ;;  %v1667_v60 = vld [vmem:[#allocation2 + $0x1f9] sm:$0xff] }
  0xf2   :  { %v1985_v8 = vadd.f32 %v1921_v12, %v1791_v53  ;;  %v1598_v25 = vadd.f32 %v1534_v9, %v1403_v59  ;;  %v568_v3 = vmul.f32 %v2371_v32, %v502_v10  ;;  %v1922_v18 = vmul.f32 %v2471_v34, %v1856_v50  ;;  %v1085_v10 = vld [vmem:[#allocation2 + $0x1e9] sm:$0xff] }
  0xf3   :  { %v1729_v2 = vmul.f32 %v3306_v38, %v1663_v13  ;;  %v823_v42 = vadd.f32 %v759_v52, %v629_v24  ;;  %v1404_v28 = vadd.f32 %v1340_v41, %v1210_v55  ;;  %v762_v21 = vmul.f32 %v2387_v43, %v696_v49  ;;  %v1279_v52 = vld [vmem:[#allocation2 + $0x1ea] sm:$0xff] }
  0xf4   :  { %2049 = vst [vmem:[#allocation8 + $0xe0] sm:$0xff] %v1985_v8  ;;  %v1792_v27 = vadd.f32 %v1728_v35, %v1598_v25  ;;  %v632_v0 = vadd.f32 %v568_v3, %v374_v45  ;;  %v1147_v11 = vmul.f32 %v1662_v61, %v3301_v40  ;;  %v956_v62 = vmul.f32 %v2394_v48, %v890_v4  ;;  %v1473_v35 = vld [vmem:[#allocation2 + $0x1f8] sm:$0xff] }
  0xf5   :  { %v1017_v7 = vadd.f32 %v953_v6, %v823_v42  ;;  %v1599_v33 = vadd.f32 %v1535_v54, %v1404_v28  ;;  %v375_v47 = vmul.f32 %v2368_v31, %v309_v58  ;;  %v1923_v44 = vmul.f32 %v2471_v34, %v1857_v30  ;;  %v1861_v3 = vld [vmem:[#allocation2 + $0x1fa] sm:$0xff] }
  0xf6   :  { %v1986_v57 = vadd.f32 %v1922_v18, %v1792_v27  ;;  %v826_v1 = vadd.f32 %v762_v21, %v632_v0  ;;  %v1341_v12 = vmul.f32 %v1856_v50, %v2428_v63  ;;  %v569_v9 = vmul.f32 %v2371_v32, %v503_v16  ;;  %v1668_v21 = vld [vmem:[#allocation2 + $0x201] sm:$0xff] }
  0xf7   :  { %v1211_v23 = vadd.f32 %v1147_v11, %v1017_v7  ;;  %v1793_v61 = vadd.f32 %v1729_v2, %v1599_v33  ;;  %v1730_v5 = vmul.f32 %v3306_v38, %v1664_v46  ;;  %v1150_v39 = vmul.f32 %v3301_v40, %v1084_v26  ;;  %v1474_v2 = vld [vmem:[#allocation2 + $0x200] sm:$0xff] }
  0xf8   :  { %2050 = vst [vmem:[#allocation8 + $0xe8] sm:$0xff] %v1986_v57  ;;  %v1020_v15 = vadd.f32 %v956_v62, %v826_v1  ;;  %v1924_v51 = vmul.f32 %v2471_v34, %v1858_v20  ;;  %v633_v41 = vadd.f32 %v569_v9, %v375_v47  ;;  %v763_v56 = vmul.f32 %v2387_v43, %v697_v36  ;;  %v1862_v33 = vld [vmem:[#allocation2 + $0x202] sm:$0xff]  ;;  %v1475_v1 = vld [vmem:[#allocation2 + $0x210] sm:$0xff] }
  0xf9   :  { %v1405_v22 = vadd.f32 %v1341_v12, %v1211_v23  ;;  %v1987_v53 = vadd.f32 %v1923_v44, %v1793_v61  ;;  %v1344_v50 = vmul.f32 %v2428_v63, %v1278_v37  ;;  %v376_v29 = vmul.f32 %v890_v4, %v2368_v31  ;;  %v1669_v47 = vld [vmem:[#allocation2 + $0x211] sm:$0xff] }
  0xfa   :  { %v1214_v59 = vadd.f32 %v1150_v39, %v1020_v15  ;;  %v827_v13 = vadd.f32 %v763_v56, %v633_v41  ;;  %v957_v24 = vmul.f32 %v2394_v48, %v891_v17  ;;  %v570_v6 = vmul.f32 %v1084_v26, %v2371_v32  ;;  %v1863_v15 = vld [vmem:[#allocation2 + $0x212] sm:$0xff] }
  0xfb   :  { %v1600_v14 = vadd.f32 %v1535_v54, %v1405_v22  ;;  %2051 = vst [vmem:[#allocation8 + $0xf0] sm:$0xff] %v1987_v53  ;;  %v1539_v49 = vmul.f32 %v2439_v19, %v1473_v35  ;;  %v1733_v8 = vmul.f32 %v3306_v38, %v1667_v60  ;;  %v1151_v25 = vmul.f32 %v3301_v40, %v1085_v10 }
  0xfc   :  { %v1408_v45 = vadd.f32 %v1344_v50, %v1214_v59  ;;  %v1021_v18 = vadd.f32 %v957_v24, %v827_v13  ;;  %v634_v4 = vadd.f32 %v570_v6, %v376_v29  ;;  %v764_v54 = vmul.f32 %v1278_v37, %v2387_v43  ;;  %v1476_v29 = vld [vmem:[#allocation2 + $0x218] sm:$0xff] }
  0xfd   :  { %v1794_v55 = vadd.f32 %v1730_v5, %v1600_v14  ;;  %v1345_v58 = vmul.f32 %v2428_v63, %v1279_v52  ;;  %v958_v27 = vmul.f32 %v1473_v35, %v2394_v48  ;;  %v377_v28 = vmul.f32 %v891_v17, %v2368_v31  ;;  %v1864_v24 = vld [vmem:[#allocation2 + $0x21a] sm:$0xff] }
  0xfe   :  { %v1603_v42 = vadd.f32 %v1539_v49, %v1408_v45  ;;  %v1215_v0 = vadd.f32 %v1151_v25, %v1021_v18  ;;  %v828_v16 = vadd.f32 %v764_v54, %v634_v4  ;;  %v571_v7 = vmul.f32 %v1085_v10, %v2371_v32 }
  0xff   :  { %v1988_v30 = vadd.f32 %v1924_v51, %v1794_v55  ;;  %v1927_v46 = vmul.f32 %v2471_v34, %v1861_v3  ;;  %v1540_v62 = vmul.f32 %v2439_v19, %v1474_v2  ;;  %v1152_v26 = vmul.f32 %v1667_v60, %v3301_v40 }
 0x100   :  { %v1797_v11 = vadd.f32 %v1733_v8, %v1603_v42  ;;  %v1409_v57 = vadd.f32 %v1345_v58, %v1215_v0  ;;  %v1022_v20 = vadd.f32 %v958_v27, %v828_v16  ;;  %v635_v36 = vadd.f32 %v571_v7, %v377_v28  ;;  %v1671_v0 = vld [vmem:[#allocation2 + $0x229] sm:$0xff] }
 0x101   :  { %2052 = vst [vmem:[#allocation8 + $0xf8] sm:$0xff] %v1988_v30  ;;  %v765_v44 = vmul.f32 %v1279_v52, %v2387_v43  ;;  %v1734_v12 = vmul.f32 %v3306_v38, %v1668_v21  ;;  %v1346_v37 = vmul.f32 %v1861_v3, %v2428_v63  ;;  %v959_v9 = vmul.f32 %v1474_v2, %v2394_v48  ;;  %v1477_v30 = vld [vmem:[#allocation2 + $0x228] sm:$0xff] }
 0x102   :  { %v1991_v23 = vadd.f32 %v1927_v46, %v1797_v11  ;;  %v1604_v61 = vadd.f32 %v1540_v62, %v1409_v57  ;;  %v1216_v5 = vadd.f32 %v1152_v26, %v1022_v20  ;;  %v378_v17 = vmul.f32 %v1473_v35, %v2368_v31  ;;  %v1670_v35 = vld [vmem:[#allocation2 + $0x219] sm:$0xff] }
 0x103   :  { %v829_v39 = vadd.f32 %v765_v44, %v635_v36  ;;  %v1928_v22 = vmul.f32 %v2471_v34, %v1862_v33  ;;  %v1541_v51 = vmul.f32 %v2439_v19, %v1475_v1  ;;  %v1735_v41 = vmul.f32 %v3306_v38, %v1669_v47 }
 0x104   :  { %2055 = vst [vmem:[#allocation8 + $0x110] sm:$0xff] %v1991_v23  ;;  %v572_v56 = vmul.f32 %v1667_v60, %v2371_v32  ;;  %v1798_v10 = vadd.f32 %v1734_v12, %v1604_v61  ;;  %v1410_v53 = vadd.f32 %v1346_v37, %v1216_v5  ;;  %v1153_v50 = vmul.f32 %v1668_v21, %v3301_v40  ;;  %v1865_v37 = vld [vmem:[#allocation2 + $0x22a] sm:$0xff] }
 0x105   :  { %v1023_v59 = vadd.f32 %v959_v9, %v829_v39  ;;  %v1929_v14 = vmul.f32 %v2471_v34, %v1863_v15  ;;  %v1347_v13 = vmul.f32 %v1862_v33, %v2428_v63  ;;  %v766_v6 = vmul.f32 %v1861_v3, %v2387_v43  ;;  %v1478_v61 = vld [vmem:[#allocation2 + $0x230] sm:$0xff] }
 0x106   :  { %v636_v52 = vadd.f32 %v572_v56, %v378_v17  ;;  %v1992_v45 = vadd.f32 %v1928_v22, %v1798_v10  ;;  %v1605_v49 = vadd.f32 %v1541_v51, %v1410_v53  ;;  %v379_v60 = vmul.f32 %v1474_v2, %v2368_v31  ;;  %v1672_v56 = vld [vmem:[#allocation2 + $0x231] sm:$0xff] }
 0x107   :  { %v1217_v8 = vadd.f32 %v1153_v50, %v1023_v59  ;;  %v1542_v25 = vmul.f32 %v2439_v19, %v1476_v29  ;;  %v960_v18 = vmul.f32 %v1475_v1, %v2394_v48  ;;  %v573_v4 = vmul.f32 %v1668_v21, %v2371_v32 }
 0x108   :  { %v830_v55 = vadd.f32 %v766_v6, %v636_v52  ;;  %2056 = vst [vmem:[#allocation8 + $0x118] sm:$0xff] %v1992_v45  ;;  %v1799_v54 = vadd.f32 %v1735_v41, %v1605_v49  ;;  %v1736_v58 = vmul.f32 %v3306_v38, %v1670_v35  ;;  %v1930_v27 = vmul.f32 %v2471_v34, %v1864_v24  ;;  %v1866_v6 = vld [vmem:[#allocation2 + $0x232] sm:$0xff]  ;;  %v1673_v49 = vld [vmem:[#allocation2 + $0x241] sm:$0xff] }
 0x109   :  { %v1411_v42 = vadd.f32 %v1347_v13, %v1217_v8  ;;  %v1154_v28 = vmul.f32 %v1669_v47, %v3301_v40  ;;  %v637_v2 = vadd.f32 %v573_v4, %v379_v60  ;;  %v767_v16 = vmul.f32 %v1862_v33, %v2387_v43 }
 0x10a   :  { %v1024_v3 = vadd.f32 %v960_v18, %v830_v55  ;;  %v1993_v7 = vadd.f32 %v1929_v14, %v1799_v54  ;;  %v1348_v46 = vmul.f32 %v1863_v15, %v2428_v63  ;;  %v380_v21 = vmul.f32 %v1475_v1, %v2368_v31 }
 0x10b   :  { %v1606_v11 = vadd.f32 %v1542_v25, %v1411_v42  ;;  %v831_v26 = vadd.f32 %v767_v16, %v637_v2  ;;  %v961_v57 = vmul.f32 %v1476_v29, %v2394_v48  ;;  %v574_v20 = vmul.f32 %v1669_v47, %v2371_v32  ;;  %v1867_v42 = vld [vmem:[#allocation2 + $0x242] sm:$0xff] }
 0x10c   :  { %v1218_v62 = vadd.f32 %v1154_v28, %v1024_v3  ;;  %2057 = vst [vmem:[#allocation8 + $0x120] sm:$0xff] %v1993_v7  ;;  %v1543_v44 = vmul.f32 %v2439_v19, %v1477_v30  ;;  %v1737_v23 = vmul.f32 %v3306_v38, %v1671_v0  ;;  %v1155_v33 = vmul.f32 %v1670_v35, %v3301_v40 }
 0x10d   :  { %v1800_v36 = vadd.f32 %v1736_v58, %v1606_v11  ;;  %v1025_v9 = vadd.f32 %v961_v57, %v831_v26  ;;  %v638_v5 = vadd.f32 %v574_v20, %v380_v21  ;;  %v768_v1 = vmul.f32 %v1863_v15, %v2387_v43  ;;  %v1868_v26 = vld [vmem:[#allocation2 + $0x24a] sm:$0xff] }
 0x10e   :  { %v1412_v12 = vadd.f32 %v1348_v46, %v1218_v62  ;;  %v1349_v17 = vmul.f32 %v1864_v24, %v2428_v63  ;;  %v962_v47 = vmul.f32 %v1477_v30, %v2394_v48  ;;  %v381_v22 = vmul.f32 %v1476_v29, %v2368_v31  ;;  %v1479_v29 = vld [vmem:[#allocation2 + $0x240] sm:$0xff]  ;;  %v1674_v62 = vld [vmem:[#allocation2 + $0x249] sm:$0xff] }
 0x10f   :  { %v1994_v39 = vadd.f32 %v1930_v27, %v1800_v36  ;;  %v1219_v41 = vadd.f32 %v1155_v33, %v1025_v9  ;;  %v832_v10 = vadd.f32 %v768_v1, %v638_v5  ;;  %v575_v53 = vmul.f32 %v1670_v35, %v2371_v32 }
 0x110   :  { %v1607_v51 = vadd.f32 %v1543_v44, %v1412_v12  ;;  %v1931_v59 = vmul.f32 %v2471_v34, %v1865_v37  ;;  %v1544_v50 = vmul.f32 %v2439_v19, %v1478_v61  ;;  %v1156_v15 = vmul.f32 %v1671_v0, %v3301_v40 }
 0x111   :  { %2058 = vst [vmem:[#allocation8 + $0x128] sm:$0xff] %v1994_v39  ;;  %v769_v14 = vmul.f32 %v1864_v24, %v2387_v43  ;;  %v1413_v52 = vadd.f32 %v1349_v17, %v1219_v41  ;;  %v1026_v45 = vadd.f32 %v962_v47, %v832_v10  ;;  %v639_v8 = vadd.f32 %v575_v53, %v381_v22  ;;  %v1675_v41 = vld [vmem:[#allocation2 + $0x259] sm:$0xff] }
 0x112   :  { %v1801_v13 = vadd.f32 %v1737_v23, %v1607_v51  ;;  %v1738_v60 = vmul.f32 %v3306_v38, %v1672_v56  ;;  %v1350_v35 = vmul.f32 %v1865_v37, %v2428_v63  ;;  %v963_v25 = vmul.f32 %v1478_v61, %v2394_v48  ;;  %v1481_v51 = vld [vmem:[#allocation2 + $0x258] sm:$0xff] }
 0x113   :  { %v382_v55 = vmul.f32 %v1477_v30, %v2368_v31  ;;  %v1608_v4 = vadd.f32 %v1544_v50, %v1413_v52  ;;  %v1220_v54 = vadd.f32 %v1156_v15, %v1026_v45  ;;  %v833_v24 = vadd.f32 %v769_v14, %v639_v8  ;;  %v1480_v30 = vld [vmem:[#allocation2 + $0x248] sm:$0xff] }
 0x114   :  { %v1995_v18 = vadd.f32 %v1931_v59, %v1801_v13  ;;  %v1932_v58 = vmul.f32 %v2471_v34, %v1866_v6  ;;  %v1545_v27 = vmul.f32 %v2439_v19, %v1479_v29  ;;  %v1739_v3 = vmul.f32 %v3306_v38, %v1673_v49 }
 0x115   :  { %v576_v28 = vmul.f32 %v1671_v0, %v2371_v32  ;;  %v1802_v2 = vadd.f32 %v1738_v60, %v1608_v4  ;;  %v1414_v16 = vadd.f32 %v1350_v35, %v1220_v54  ;;  %v1027_v7 = vadd.f32 %v963_v25, %v833_v24  ;;  %v1869_v25 = vld [vmem:[#allocation2 + $0x25a] sm:$0xff] }
 0x116   :  { %2059 = vst [vmem:[#allocation8 + $0x130] sm:$0xff] %v1995_v18  ;;  %v1157_v11 = vmul.f32 %v1672_v56, %v3301_v40  ;;  %v1933_v46 = vmul.f32 %v2471_v34, %v1867_v42  ;;  %v1351_v21 = vmul.f32 %v1866_v6, %v2428_v63  ;;  %v770_v20 = vmul.f32 %v1865_v37, %v2387_v43  ;;  %v1482_v18 = vld [vmem:[#allocation2 + $0x260] sm:$0xff] }
 0x117   :  { %v640_v57 = vadd.f32 %v576_v28, %v382_v55  ;;  %v1996_v36 = vadd.f32 %v1932_v58, %v1802_v2  ;;  %v1609_v44 = vadd.f32 %v1545_v27, %v1414_v16  ;;  %v383_v0 = vmul.f32 %v1478_v61, %v2368_v31  ;;  %v1676_v28 = vld [vmem:[#allocation2 + $0x261] sm:$0xff] }
 0x118   :  { %v1221_v23 = vadd.f32 %v1157_v11, %v1027_v7  ;;  %v1546_v33 = vmul.f32 %v2439_v19, %v1480_v30  ;;  %v964_v9 = vmul.f32 %v1479_v29, %v2394_v48  ;;  %v577_v5 = vmul.f32 %v1672_v56, %v2371_v32 }
 0x119   :  { %v834_v12 = vadd.f32 %v770_v20, %v640_v57  ;;  %2060 = vst [vmem:[#allocation8 + $0x138] sm:$0xff] %v1996_v36  ;;  %v1803_v1 = vadd.f32 %v1739_v3, %v1609_v44  ;;  %v1740_v17 = vmul.f32 %v3306_v38, %v1674_v62  ;;  %v1934_v47 = vmul.f32 %v2471_v34, %v1868_v26  ;;  %v1870_v20 = vld [vmem:[#allocation2 + $0x262] sm:$0xff]  ;;  %v1677_v44 = vld [vmem:[#allocation2 + $0x271] sm:$0xff] }
 0x11a   :  { %v1415_v39 = vadd.f32 %v1351_v21, %v1221_v23  ;;  %v1158_v22 = vmul.f32 %v1673_v49, %v3301_v40  ;;  %v641_v61 = vadd.f32 %v577_v5, %v383_v0  ;;  %v771_v10 = vmul.f32 %v1866_v6, %v2387_v43 }
 0x11b   :  { %v1028_v37 = vadd.f32 %v964_v9, %v834_v12  ;;  %v1997_v53 = vadd.f32 %v1933_v46, %v1803_v1  ;;  %v1352_v50 = vmul.f32 %v1867_v42, %v2428_v63  ;;  %v384_v56 = vmul.f32 %v1479_v29, %v2368_v31 }
 0x11c   :  { %v1610_v59 = vadd.f32 %v1546_v33, %v1415_v39  ;;  %v835_v14 = vadd.f32 %v771_v10, %v641_v61  ;;  %v965_v13 = vmul.f32 %v1480_v30, %v2394_v48  ;;  %v578_v52 = vmul.f32 %v1673_v49, %v2371_v32  ;;  %v1871_v39 = vld [vmem:[#allocation2 + $0x272] sm:$0xff] }
 0x11d   :  { %v1222_v15 = vadd.f32 %v1158_v22, %v1028_v37  ;;  %2061 = vst [vmem:[#allocation8 + $0x140] sm:$0xff] %v1997_v53  ;;  %v1547_v8 = vmul.f32 %v2439_v19, %v1481_v51  ;;  %v1741_v60 = vmul.f32 %v3306_v38, %v1675_v41  ;;  %v1159_v6 = vmul.f32 %v1674_v62, %v3301_v40 }
 0x11e   :  { %v1804_v45 = vadd.f32 %v1740_v17, %v1610_v59  ;;  %v1029_v55 = vadd.f32 %v965_v13, %v835_v14  ;;  %v642_v4 = vadd.f32 %v578_v52, %v384_v56  ;;  %v772_v29 = vmul.f32 %v1867_v42, %v2387_v43  ;;  %v1872_v14 = vld [vmem:[#allocation2 + $0x27a] sm:$0xff] }
 0x11f   :  { %v1416_v35 = vadd.f32 %v1352_v50, %v1222_v15  ;;  %v1353_v24 = vmul.f32 %v1868_v26, %v2428_v63  ;;  %v966_v49 = vmul.f32 %v1481_v51, %v2394_v48  ;;  %v385_v58 = vmul.f32 %v1480_v30, %v2368_v31  ;;  %v1483_v30 = vld [vmem:[#allocation2 + $0x270] sm:$0xff]  ;;  %v1678_v15 = vld [vmem:[#allocation2 + $0x279] sm:$0xff] }
 0x120   :  { %v1998_v54 = vadd.f32 %v1934_v47, %v1804_v45  ;;  %v1223_v3 = vadd.f32 %v1159_v6, %v1029_v55  ;;  %v836_v2 = vadd.f32 %v772_v29, %v642_v4  ;;  %v579_v16 = vmul.f32 %v1674_v62, %v2371_v32 }
 0x121   :  { %v1611_v27 = vadd.f32 %v1547_v8, %v1416_v35  ;;  %v1935_v7 = vmul.f32 %v2471_v34, %v1869_v25  ;;  %v1548_v11 = vmul.f32 %v2439_v19, %v1482_v18  ;;  %v1160_v42 = vmul.f32 %v1675_v41, %v3301_v40 }
 0x122   :  { %2062 = vst [vmem:[#allocation8 + $0x148] sm:$0xff] %v1998_v54  ;;  %v773_v46 = vmul.f32 %v1868_v26, %v2387_v43  ;;  %v1417_v57 = vadd.f32 %v1353_v24, %v1223_v3  ;;  %v1030_v36 = vadd.f32 %v966_v49, %v836_v2  ;;  %v643_v23 = vadd.f32 %v579_v16, %v385_v58  ;;  %v1679_v3 = vld [vmem:[#allocation2 + $0x289] sm:$0xff] }
 0x123   :  { %v1805_v21 = vadd.f32 %v1741_v60, %v1611_v27  ;;  %v1742_v0 = vmul.f32 %v3306_v38, %v1676_v28  ;;  %v1354_v62 = vmul.f32 %v1869_v25, %v2428_v63  ;;  %v967_v33 = vmul.f32 %v1482_v18, %v2394_v48  ;;  %v1485_v27 = vld [vmem:[#allocation2 + $0x288] sm:$0xff] }
 0x124   :  { %v386_v12 = vmul.f32 %v1481_v51, %v2368_v31  ;;  %v1612_v5 = vadd.f32 %v1548_v11, %v1417_v57  ;;  %v1224_v1 = vadd.f32 %v1160_v42, %v1030_v36  ;;  %v837_v26 = vadd.f32 %v773_v46, %v643_v23  ;;  %v1484_v51 = vld [vmem:[#allocation2 + $0x278] sm:$0xff] }
 0x125   :  { %v1999_v9 = vadd.f32 %v1935_v7, %v1805_v21  ;;  %v1936_v17 = vmul.f32 %v2471_v34, %v1870_v20  ;;  %v1549_v47 = vmul.f32 %v2439_v19, %v1483_v30  ;;  %v1743_v37 = vmul.f32 %v3306_v38, %v1677_v44 }
 0x126   :  { %v580_v22 = vmul.f32 %v1675_v41, %v2371_v32  ;;  %v1806_v61 = vadd.f32 %v1742_v0, %v1612_v5  ;;  %v1418_v10 = vadd.f32 %v1354_v62, %v1224_v1  ;;  %v1031_v53 = vadd.f32 %v967_v33, %v837_v26  ;;  %v1873_v33 = vld [vmem:[#allocation2 + $0x28a] sm:$0xff] }
 0x127   :  { %2063 = vst [vmem:[#allocation8 + $0x150] sm:$0xff] %v1999_v9  ;;  %v1161_v59 = vmul.f32 %v1676_v28, %v3301_v40  ;;  %v1937_v50 = vmul.f32 %v2471_v34, %v1871_v39  ;;  %v1355_v56 = vmul.f32 %v1870_v20, %v2428_v63  ;;  %v774_v52 = vmul.f32 %v1869_v25, %v2387_v43  ;;  %v1486_v9 = vld [vmem:[#allocation2 + $0x290] sm:$0xff] }
 0x128   :  { %v644_v13 = vadd.f32 %v580_v22, %v386_v12  ;;  %v2000_v45 = vadd.f32 %v1936_v17, %v1806_v61  ;;  %v1613_v8 = vadd.f32 %v1549_v47, %v1418_v10  ;;  %v387_v41 = vmul.f32 %v1482_v18, %v2368_v31  ;;  %v1680_v22 = vld [vmem:[#allocation2 + $0x291] sm:$0xff] }
 0x129   :  { %v1225_v60 = vadd.f32 %v1161_v59, %v1031_v53  ;;  %v1550_v6 = vmul.f32 %v2439_v19, %v1484_v51  ;;  %v968_v55 = vmul.f32 %v1483_v30, %v2394_v48  ;;  %v581_v4 = vmul.f32 %v1676_v28, %v2371_v32 }
 0x12a   :  { %v838_v35 = vadd.f32 %v774_v52, %v644_v13  ;;  %2064 = vst [vmem:[#allocation8 + $0x158] sm:$0xff] %v2000_v45  ;;  %v1807_v29 = vadd.f32 %v1743_v37, %v1613_v8  ;;  %v1744_v24 = vmul.f32 %v3306_v38, %v1678_v15  ;;  %v1938_v49 = vmul.f32 %v2471_v34, %v1872_v14  ;;  %v1874_v52 = vld [vmem:[#allocation2 + $0x292] sm:$0xff]  ;;  %v1681_v8 = vld [vmem:[#allocation2 + $0x2a1] sm:$0xff] }
 0x12b   :  { %v1419_v54 = vadd.f32 %v1355_v56, %v1225_v60  ;;  %v1162_v58 = vmul.f32 %v1677_v44, %v3301_v40  ;;  %v645_v18 = vadd.f32 %v581_v4, %v387_v41  ;;  %v775_v2 = vmul.f32 %v1870_v20, %v2387_v43 }
 0x12c   :  { %v1032_v25 = vadd.f32 %v968_v55, %v838_v35  ;;  %v2001_v16 = vadd.f32 %v1937_v50, %v1807_v29  ;;  %v1356_v11 = vmul.f32 %v1871_v39, %v2428_v63  ;;  %v388_v28 = vmul.f32 %v1483_v30, %v2368_v31 }
 0x12d   :  { %v1614_v7 = vadd.f32 %v1550_v6, %v1419_v54  ;;  %v839_v46 = vadd.f32 %v775_v2, %v645_v18  ;;  %v969_v21 = vmul.f32 %v1484_v51, %v2394_v48  ;;  %v582_v57 = vmul.f32 %v1677_v44, %v2371_v32  ;;  %v1875_v54 = vld [vmem:[#allocation2 + $0x2a2] sm:$0xff] }
 0x12e   :  { %v1226_v42 = vadd.f32 %v1162_v58, %v1032_v25  ;;  %2065 = vst [vmem:[#allocation8 + $0x160] sm:$0xff] %v2001_v16  ;;  %v1551_v23 = vmul.f32 %v2439_v19, %v1485_v27  ;;  %v1745_v0 = vmul.f32 %v3306_v38, %v1679_v3  ;;  %v1163_v20 = vmul.f32 %v1678_v15, %v3301_v40 }
 0x12f   :  { %v1808_v36 = vadd.f32 %v1744_v24, %v1614_v7  ;;  %v1033_v12 = vadd.f32 %v969_v21, %v839_v46  ;;  %v646_v5 = vadd.f32 %v582_v57, %v388_v28  ;;  %v776_v30 = vmul.f32 %v1871_v39, %v2387_v43  ;;  %v1876_v46 = vld [vmem:[#allocation2 + $0x2aa] sm:$0xff] }
 0x130   :  { %v1420_v62 = vadd.f32 %v1356_v11, %v1226_v42  ;;  %v1357_v26 = vmul.f32 %v1872_v14, %v2428_v63  ;;  %v970_v44 = vmul.f32 %v1485_v27, %v2394_v48  ;;  %v389_v17 = vmul.f32 %v1484_v51, %v2368_v31  ;;  %v1487_v51 = vld [vmem:[#allocation2 + $0x2a0] sm:$0xff]  ;;  %v1682_v42 = vld [vmem:[#allocation2 + $0x2a9] sm:$0xff] }
 0x131   :  { %v2002_v1 = vadd.f32 %v1938_v49, %v1808_v36  ;;  %v1227_v37 = vadd.f32 %v1163_v20, %v1033_v12  ;;  %v840_v61 = vadd.f32 %v776_v30, %v646_v5  ;;  %v583_v10 = vmul.f32 %v1678_v15, %v2371_v32 }
 0x132   :  { %v1615_v47 = vadd.f32 %v1551_v23, %v1420_v62  ;;  %v1939_v53 = vmul.f32 %v2471_v34, %v1873_v33  ;;  %v1552_v59 = vmul.f32 %v2439_v19, %v1486_v9  ;;  %v1164_v39 = vmul.f32 %v1679_v3, %v3301_v40 }
 0x133   :  { %2066 = vst [vmem:[#allocation8 + $0x168] sm:$0xff] %v2002_v1  ;;  %v777_v50 = vmul.f32 %v1872_v14, %v2387_v43  ;;  %v1421_v13 = vadd.f32 %v1357_v26, %v1227_v37  ;;  %v1034_v45 = vadd.f32 %v970_v44, %v840_v61  ;;  %v647_v60 = vadd.f32 %v583_v10, %v389_v17  ;;  %v1683_v37 = vld [vmem:[#allocation2 + $0x2b9] sm:$0xff] }
 0x134   :  { %v1809_v56 = vadd.f32 %v1745_v0, %v1615_v47  ;;  %v1746_v41 = vmul.f32 %v3306_v38, %v1680_v22  ;;  %v1358_v15 = vmul.f32 %v1873_v33, %v2428_v63  ;;  %v971_v6 = vmul.f32 %v1486_v9, %v2394_v48  ;;  %v1489_v47 = vld [vmem:[#allocation2 + $0x2b8] sm:$0xff] }
 0x135   :  { %v390_v35 = vmul.f32 %v1485_v27, %v2368_v31  ;;  %v1616_v4 = vadd.f32 %v1552_v59, %v1421_v13  ;;  %v1228_v29 = vadd.f32 %v1164_v39, %v1034_v45  ;;  %v841_v14 = vadd.f32 %v777_v50, %v647_v60  ;;  %v1488_v27 = vld [vmem:[#allocation2 + $0x2a8] sm:$0xff] }
 0x136   :  { %v2003_v55 = vadd.f32 %v1939_v53, %v1809_v56  ;;  %v1940_v24 = vmul.f32 %v2471_v34, %v1874_v52  ;;  %v1553_v49 = vmul.f32 %v2439_v19, %v1487_v51  ;;  %v1747_v25 = vmul.f32 %v3306_v38, %v1681_v8 }
 0x137   :  { %v584_v58 = vmul.f32 %v1679_v3, %v2371_v32  ;;  %v1810_v18 = vadd.f32 %v1746_v41, %v1616_v4  ;;  %v1422_v2 = vadd.f32 %v1358_v15, %v1228_v29  ;;  %v1035_v16 = vadd.f32 %v971_v6, %v841_v14  ;;  %v1877_v6 = vld [vmem:[#allocation2 + $0x2ba] sm:$0xff] }
 0x138   :  { %2067 = vst [vmem:[#allocation8 + $0x170] sm:$0xff] %v2003_v55  ;;  %v1165_v7 = vmul.f32 %v1680_v22, %v3301_v40  ;;  %v1941_v11 = vmul.f32 %v2471_v34, %v1875_v54  ;;  %v1359_v28 = vmul.f32 %v1874_v52, %v2428_v63  ;;  %v778_v57 = vmul.f32 %v1873_v33, %v2387_v43  ;;  %v1490_v55 = vld [vmem:[#allocation2 + $0x2c0] sm:$0xff] }
 0x139   :  { %v648_v21 = vadd.f32 %v584_v58, %v390_v35  ;;  %v2004_v36 = vadd.f32 %v1940_v24, %v1810_v18  ;;  %v1617_v23 = vadd.f32 %v1553_v49, %v1422_v2  ;;  %v391_v3 = vmul.f32 %v1486_v9, %v2368_v31  ;;  %v1684_v58 = vld [vmem:[#allocation2 + $0x2c1] sm:$0xff] }
 0x13a   :  { %v1229_v0 = vadd.f32 %v1165_v7, %v1035_v16  ;;  %v1554_v20 = vmul.f32 %v2439_v19, %v1488_v27  ;;  %v972_v12 = vmul.f32 %v1487_v51, %v2394_v48  ;;  %v585_v5 = vmul.f32 %v1680_v22, %v2371_v32 }
 0x13b   :  { %v842_v62 = vadd.f32 %v778_v57, %v648_v21  ;;  %2068 = vst [vmem:[#allocation8 + $0x178] sm:$0xff] %v2004_v36  ;;  %v1811_v30 = vadd.f32 %v1747_v25, %v1617_v23  ;;  %v1748_v26 = vmul.f32 %v3306_v38, %v1682_v42  ;;  %v1942_v44 = vmul.f32 %v2471_v34, %v1876_v46  ;;  %v1878_v57 = vld [vmem:[#allocation2 + $0x2c2] sm:$0xff]  ;;  %v1685_v23 = vld [vmem:[#allocation2 + $0x2d1] sm:$0xff] }
 0x13c   :  { %v1423_v1 = vadd.f32 %v1359_v28, %v1229_v0  ;;  %v1166_v17 = vmul.f32 %v1681_v8, %v3301_v40  ;;  %v649_v9 = vadd.f32 %v585_v5, %v391_v3  ;;  %v779_v61 = vmul.f32 %v1874_v52, %v2387_v43 }
 0x13d   :  { %v1036_v33 = vadd.f32 %v972_v12, %v842_v62  ;;  %v2005_v10 = vadd.f32 %v1941_v11, %v1811_v30  ;;  %v1360_v59 = vmul.f32 %v1875_v54, %v2428_v63  ;;  %v392_v22 = vmul.f32 %v1487_v51, %v2368_v31 }
 0x13e   :  { %v1618_v53 = vadd.f32 %v1554_v20, %v1423_v1  ;;  %v843_v50 = vadd.f32 %v779_v61, %v649_v9  ;;  %v973_v56 = vmul.f32 %v1488_v27, %v2394_v48  ;;  %v586_v13 = vmul.f32 %v1681_v8, %v2371_v32  ;;  %v1879_v1 = vld [vmem:[#allocation2 + $0x2d2] sm:$0xff] }
 0x13f   :  { %v1230_v39 = vadd.f32 %v1166_v17, %v1036_v33  ;;  %2069 = vst [vmem:[#allocation8 + $0x180] sm:$0xff] %v2005_v10  ;;  %v1555_v60 = vmul.f32 %v2439_v19, %v1489_v47  ;;  %v1749_v41 = vmul.f32 %v3306_v38, %v1683_v37  ;;  %v1167_v52 = vmul.f32 %v1682_v42, %v3301_v40 }
 0x140   :  { %v1812_v45 = vadd.f32 %v1748_v26, %v1618_v53  ;;  %v1037_v35 = vadd.f32 %v973_v56, %v843_v50  ;;  %v650_v4 = vadd.f32 %v586_v13, %v392_v22  ;;  %v780_v51 = vmul.f32 %v1875_v54, %v2387_v43  ;;  %v1880_v50 = vld [vmem:[#allocation2 + $0x2da] sm:$0xff] }
 0x141   :  { %v1424_v15 = vadd.f32 %v1360_v59, %v1230_v39  ;;  %v1361_v14 = vmul.f32 %v1876_v46, %v2428_v63  ;;  %v974_v8 = vmul.f32 %v1489_v47, %v2394_v48  ;;  %v393_v24 = vmul.f32 %v1488_v27, %v2368_v31  ;;  %v1491_v27 = vld [vmem:[#allocation2 + $0x2d0] sm:$0xff]  ;;  %v1686_v39 = vld [vmem:[#allocation2 + $0x2d9] sm:$0xff] }
 0x142   :  { %v2006_v29 = vadd.f32 %v1942_v44, %v1812_v45  ;;  %v1231_v25 = vadd.f32 %v1167_v52, %v1037_v35  ;;  %v844_v18 = vadd.f32 %v780_v51, %v650_v4  ;;  %v587_v2 = vmul.f32 %v1682_v42, %v2371_v32 }
 0x143   :  { %v1619_v49 = vadd.f32 %v1555_v60, %v1424_v15  ;;  %v1943_v16 = vmul.f32 %v2471_v34, %v1877_v6  ;;  %v1556_v7 = vmul.f32 %v2439_v19, %v1490_v55  ;;  %v1168_v54 = vmul.f32 %v1683_v37, %v3301_v40 }
 0x144   :  { %2070 = vst [vmem:[#allocation8 + $0x188] sm:$0xff] %v2006_v29  ;;  %v781_v11 = vmul.f32 %v1876_v46, %v2387_v43  ;;  %v1425_v21 = vadd.f32 %v1361_v14, %v1231_v25  ;;  %v1038_v36 = vadd.f32 %v974_v8, %v844_v18  ;;  %v651_v0 = vadd.f32 %v587_v2, %v393_v24  ;;  %v1687_v25 = vld [vmem:[#allocation2 + $0x2e9] sm:$0xff] }
 0x145   :  { %v1813_v28 = vadd.f32 %v1749_v41, %v1619_v49  ;;  %v1750_v3 = vmul.f32 %v3306_v38, %v1684_v58  ;;  %v1362_v42 = vmul.f32 %v1877_v6, %v2428_v63  ;;  %v975_v20 = vmul.f32 %v1490_v55, %v2394_v48  ;;  %v1493_v49 = vld [vmem:[#allocation2 + $0x2e8] sm:$0xff] }
 0x146   :  { %v394_v62 = vmul.f32 %v1489_v47, %v2368_v31  ;;  %v1620_v5 = vadd.f32 %v1556_v7, %v1425_v21  ;;  %v1232_v30 = vadd.f32 %v1168_v54, %v1038_v36  ;;  %v845_v46 = vadd.f32 %v781_v11, %v651_v0  ;;  %v1492_v47 = vld [vmem:[#allocation2 + $0x2d8] sm:$0xff] }
 0x147   :  { %v2007_v12 = vadd.f32 %v1943_v16, %v1813_v28  ;;  %v1944_v26 = vmul.f32 %v2471_v34, %v1878_v57  ;;  %v1557_v44 = vmul.f32 %v2439_v19, %v1491_v27  ;;  %v1751_v33 = vmul.f32 %v3306_v38, %v1685_v23 }
 0x148   :  { %v588_v17 = vmul.f32 %v1683_v37, %v2371_v32  ;;  %v1814_v9 = vadd.f32 %v1750_v3, %v1620_v5  ;;  %v1426_v61 = vadd.f32 %v1362_v42, %v1232_v30  ;;  %v1039_v10 = vadd.f32 %v975_v20, %v845_v46  ;;  %v1881_v20 = vld [vmem:[#allocation2 + $0x2ea] sm:$0xff] }
 0x149   :  { %2071 = vst [vmem:[#allocation8 + $0x190] sm:$0xff] %v2007_v12  ;;  %v1169_v53 = vmul.f32 %v1684_v58, %v3301_v40  ;;  %v1945_v59 = vmul.f32 %v2471_v34, %v1879_v1  ;;  %v1363_v22 = vmul.f32 %v1878_v57, %v2428_v63  ;;  %v782_v13 = vmul.f32 %v1877_v6, %v2387_v43  ;;  %v1494_v12 = vld [vmem:[#allocation2 + $0x2f0] sm:$0xff] }
 0x14a   :  { %v652_v56 = vadd.f32 %v588_v17, %v394_v62  ;;  %v2008_v45 = vadd.f32 %v1944_v26, %v1814_v9  ;;  %v1621_v60 = vadd.f32 %v1557_v44, %v1426_v61  ;;  %v395_v37 = vmul.f32 %v1490_v55, %v2368_v31  ;;  %v1688_v17 = vld [vmem:[#allocation2 + $0x2f1] sm:$0xff] }
 0x14b   :  { %v1233_v41 = vadd.f32 %v1169_v53, %v1039_v10  ;;  %v1558_v52 = vmul.f32 %v2439_v19, %v1492_v47  ;;  %v976_v35 = vmul.f32 %v1491_v27, %v2394_v48  ;;  %v589_v4 = vmul.f32 %v1684_v58, %v2371_v32 }
 0x14c   :  { %v846_v15 = vadd.f32 %v782_v13, %v652_v56  ;;  %2072 = vst [vmem:[#allocation8 + $0x198] sm:$0xff] %v2008_v45  ;;  %v1815_v51 = vadd.f32 %v1751_v33, %v1621_v60  ;;  %v1752_v14 = vmul.f32 %v3306_v38, %v1686_v39  ;;  %v1946_v8 = vmul.f32 %v2471_v34, %v1880_v50  ;;  %v1882_v13 = vld [vmem:[#allocation2 + $0x2f2] sm:$0xff]  ;;  %v1689_v60 = vld [vmem:[#allocation2 + $0x301] sm:$0xff] }
 0x14d   :  { %v1427_v29 = vadd.f32 %v1363_v22, %v1233_v41  ;;  %v1170_v24 = vmul.f32 %v1685_v23, %v3301_v40  ;;  %v653_v55 = vadd.f32 %v589_v4, %v395_v37  ;;  %v783_v18 = vmul.f32 %v1878_v57, %v2387_v43 }
 0x14e   :  { %v1040_v6 = vadd.f32 %v976_v35, %v846_v15  ;;  %v2009_v2 = vadd.f32 %v1945_v59, %v1815_v51  ;;  %v1364_v7 = vmul.f32 %v1879_v1, %v2428_v63  ;;  %v396_v58 = vmul.f32 %v1491_v27, %v2368_v31 }
 0x14f   :  { %v1622_v16 = vadd.f32 %v1558_v52, %v1427_v29  ;;  %v847_v11 = vadd.f32 %v783_v18, %v653_v55  ;;  %v977_v28 = vmul.f32 %v1492_v47, %v2394_v48  ;;  %v590_v21 = vmul.f32 %v1685_v23, %v2371_v32  ;;  %v1883_v29 = vld [vmem:[#allocation2 + $0x302] sm:$0xff] }
 0x150   :  { %v1234_v54 = vadd.f32 %v1170_v24, %v1040_v6  ;;  %2073 = vst [vmem:[#allocation8 + $0x1a0] sm:$0xff] %v2009_v2  ;;  %v1559_v0 = vmul.f32 %v2439_v19, %v1493_v49  ;;  %v1753_v3 = vmul.f32 %v3306_v38, %v1687_v25  ;;  %v1171_v57 = vmul.f32 %v1686_v39, %v3301_v40 }
 0x151   :  { %v1816_v36 = vadd.f32 %v1752_v14, %v1622_v16  ;;  %v1041_v62 = vadd.f32 %v977_v28, %v847_v11  ;;  %v654_v5 = vadd.f32 %v590_v21, %v396_v58  ;;  %v784_v27 = vmul.f32 %v1879_v1, %v2387_v43  ;;  %v1884_v11 = vld [vmem:[#allocation2 + $0x30a] sm:$0xff] }
 0x152   :  { %v1428_v42 = vadd.f32 %v1364_v7, %v1234_v54  ;;  %v1365_v46 = vmul.f32 %v1880_v50, %v2428_v63  ;;  %v978_v23 = vmul.f32 %v1493_v49, %v2394_v48  ;;  %v397_v26 = vmul.f32 %v1492_v47, %v2368_v31  ;;  %v1495_v47 = vld [vmem:[#allocation2 + $0x300] sm:$0xff]  ;;  %v1690_v54 = vld [vmem:[#allocation2 + $0x309] sm:$0xff] }
 0x153   :  { %v2010_v30 = vadd.f32 %v1946_v8, %v1816_v36  ;;  %v1235_v33 = vadd.f32 %v1171_v57, %v1041_v62  ;;  %v848_v9 = vadd.f32 %v784_v27, %v654_v5  ;;  %v591_v61 = vmul.f32 %v1686_v39, %v2371_v32 }
 0x154   :  { %v1623_v44 = vadd.f32 %v1559_v0, %v1428_v42  ;;  %v1947_v10 = vmul.f32 %v2471_v34, %v1881_v20  ;;  %v1560_v53 = vmul.f32 %v2439_v19, %v1494_v12  ;;  %v1172_v1 = vmul.f32 %v1687_v25, %v3301_v40 }
 0x155   :  { %2074 = vst [vmem:[#allocation8 + $0x1a8] sm:$0xff] %v2010_v30  ;;  %v785_v59 = vmul.f32 %v1880_v50, %v2387_v43  ;;  %v1429_v56 = vadd.f32 %v1365_v46, %v1235_v33  ;;  %v1042_v45 = vadd.f32 %v978_v23, %v848_v9  ;;  %v655_v41 = vadd.f32 %v591_v61, %v397_v26  ;;  %v1691_v33 = vld [vmem:[#allocation2 + $0x319] sm:$0xff] }
 0x156   :  { %v1817_v22 = vadd.f32 %v1753_v3, %v1623_v44  ;;  %v1754_v37 = vmul.f32 %v3306_v38, %v1688_v17  ;;  %v1366_v39 = vmul.f32 %v1881_v20, %v2428_v63  ;;  %v979_v52 = vmul.f32 %v1494_v12, %v2394_v48  ;;  %v1497_v44 = vld [vmem:[#allocation2 + $0x318] sm:$0xff] }
 0x157   :  { %v398_v15 = vmul.f32 %v1493_v49, %v2368_v31  ;;  %v1624_v4 = vadd.f32 %v1560_v53, %v1429_v56  ;;  %v1236_v51 = vadd.f32 %v1172_v1, %v1042_v45  ;;  %v849_v50 = vadd.f32 %v785_v59, %v655_v41  ;;  %v1496_v49 = vld [vmem:[#allocation2 + $0x308] sm:$0xff] }
 0x158   :  { %v2011_v35 = vadd.f32 %v1947_v10, %v1817_v22  ;;  %v1948_v14 = vmul.f32 %v2471_v34, %v1882_v13  ;;  %v1561_v8 = vmul.f32 %v2439_v19, %v1495_v47  ;;  %v1755_v6 = vmul.f32 %v3306_v38, %v1689_v60 }
 0x159   :  { %v592_v24 = vmul.f32 %v1687_v25, %v2371_v32  ;;  %v1818_v55 = vadd.f32 %v1754_v37, %v1624_v4  ;;  %v1430_v18 = vadd.f32 %v1366_v39, %v1236_v51  ;;  %v1043_v2 = vadd.f32 %v979_v52, %v849_v50  ;;  %v1885_v52 = vld [vmem:[#allocation2 + $0x31a] sm:$0xff] }
 0x15a   :  { %2075 = vst [vmem:[#allocation8 + $0x1b0] sm:$0xff] %v2011_v35  ;;  %v1173_v16 = vmul.f32 %v1688_v17, %v3301_v40  ;;  %v1949_v7 = vmul.f32 %v2471_v34, %v1883_v29  ;;  %v1367_v58 = vmul.f32 %v1882_v13, %v2428_v63  ;;  %v786_v21 = vmul.f32 %v1881_v20, %v2387_v43  ;;  %v1498_v35 = vld [vmem:[#allocation2 + $0x320] sm:$0xff] }
 0x15b   :  { %v656_v28 = vadd.f32 %v592_v24, %v398_v15  ;;  %v2012_v36 = vadd.f32 %v1948_v14, %v1818_v55  ;;  %v1625_v0 = vadd.f32 %v1561_v8, %v1430_v18  ;;  %v399_v25 = vmul.f32 %v1494_v12, %v2368_v31  ;;  %v1692_v24 = vld [vmem:[#allocation2 + $0x321] sm:$0xff] }
 0x15c   :  { %v1237_v3 = vadd.f32 %v1173_v16, %v1043_v2  ;;  %v1562_v57 = vmul.f32 %v2439_v19, %v1496_v49  ;;  %v980_v62 = vmul.f32 %v1495_v47, %v2394_v48  ;;  %v593_v5 = vmul.f32 %v1688_v17, %v2371_v32 }
 0x15d   :  { %v850_v42 = vadd.f32 %v786_v21, %v656_v28  ;;  %2076 = vst [vmem:[#allocation8 + $0x1b8] sm:$0xff] %v2012_v36  ;;  %v1819_v27 = vadd.f32 %v1755_v6, %v1625_v0  ;;  %v1756_v46 = vmul.f32 %v3306_v38, %v1690_v54  ;;  %v1950_v23 = vmul.f32 %v2471_v34, %v1884_v11  ;;  %v1886_v21 = vld [vmem:[#allocation2 + $0x322] sm:$0xff]  ;;  %v1693_v0 = vld [vmem:[#allocation2 + $0x331] sm:$0xff] }
 0x15e   :  { %v1431_v30 = vadd.f32 %v1367_v58, %v1237_v3  ;;  %v1174_v26 = vmul.f32 %v1689_v60, %v3301_v40  ;;  %v657_v12 = vadd.f32 %v593_v5, %v399_v25  ;;  %v787_v9 = vmul.f32 %v1882_v13, %v2387_v43 }
 0x15f   :  { %v1044_v20 = vadd.f32 %v980_v62, %v850_v42  ;;  %v2013_v61 = vadd.f32 %v1949_v7, %v1819_v27  ;;  %v1368_v53 = vmul.f32 %v1883_v29, %v2428_v63  ;;  %v400_v17 = vmul.f32 %v1495_v47, %v2368_v31 }
 0x160   :  { %v1626_v10 = vadd.f32 %v1562_v57, %v1431_v30  ;;  %v851_v59 = vadd.f32 %v787_v9, %v657_v12  ;;  %v981_v22 = vmul.f32 %v1496_v49, %v2394_v48  ;;  %v594_v56 = vmul.f32 %v1689_v60, %v2371_v32  ;;  %v1887_v9 = vld [vmem:[#allocation2 + $0x332] sm:$0xff] }
 0x161   :  { %v1238_v1 = vadd.f32 %v1174_v26, %v1044_v20  ;;  %2077 = vst [vmem:[#allocation8 + $0x1c0] sm:$0xff] %v2013_v61  ;;  %v1563_v41 = vmul.f32 %v2439_v19, %v1497_v44  ;;  %v1757_v37 = vmul.f32 %v3306_v38, %v1691_v33  ;;  %v1175_v13 = vmul.f32 %v1690_v54, %v3301_v40 }
 0x162   :  { %v1820_v45 = vadd.f32 %v1756_v46, %v1626_v10  ;;  %v1045_v15 = vadd.f32 %v981_v22, %v851_v59  ;;  %v658_v4 = vadd.f32 %v594_v56, %v400_v17  ;;  %v788_v47 = vmul.f32 %v1883_v29, %v2387_v43 }
 0x163   :  { %v1432_v39 = vadd.f32 %v1368_v53, %v1238_v1  ;;  %v1369_v50 = vmul.f32 %v1884_v11, %v2428_v63  ;;  %v982_v60 = vmul.f32 %v1497_v44, %v2394_v48  ;;  %v401_v14 = vmul.f32 %v1496_v49, %v2368_v31  ;;  %v1499_v49 = vld [vmem:[#allocation2 + $0x330] sm:$0xff]  ;;  %v1500_v53 = vld [vmem:[#allocation2 + $0x338] sm:$0xff] }
 0x164   :  { %v2014_v51 = vadd.f32 %v1950_v23, %v1820_v45  ;;  %v1239_v6 = vadd.f32 %v1175_v13, %v1045_v15  ;;  %v852_v55 = vadd.f32 %v788_v47, %v658_v4  ;;  %v595_v18 = vmul.f32 %v1690_v54, %v2371_v32 }
 0x165   :  { %v1627_v8 = vadd.f32 %v1563_v41, %v1432_v39  ;;  %v1951_v2 = vmul.f32 %v2471_v34, %v1885_v52  ;;  %v1564_v16 = vmul.f32 %v2439_v19, %v1498_v35  ;;  %v1176_v29 = vmul.f32 %v1691_v33, %v3301_v40 }
 0x166   :  { %2078 = vst [vmem:[#allocation8 + $0x1c8] sm:$0xff] %v2014_v51  ;;  %v789_v7 = vmul.f32 %v1884_v11, %v2387_v43  ;;  %v1433_v28 = vadd.f32 %v1369_v50, %v1239_v6  ;;  %v1046_v36 = vadd.f32 %v982_v60, %v852_v55  ;;  %v659_v3 = vadd.f32 %v595_v18, %v401_v14  ;;  %v1888_v51 = vld [vmem:[#allocation2 + $0x33a] sm:$0xff]  ;;  %v1695_v55 = vld [vmem:[#allocation2 + $0x349] sm:$0xff] }
 0x167   :  { %v1821_v58 = vadd.f32 %v1757_v37, %v1627_v8  ;;  %v1758_v25 = vmul.f32 %v3306_v38, %v1692_v24  ;;  %v1370_v54 = vmul.f32 %v1885_v52, %v2428_v63  ;;  %v983_v57 = vmul.f32 %v1498_v35, %v2394_v48  ;;  %v1694_v37 = vld [vmem:[#allocation2 + $0x339] sm:$0xff] }
 0x168   :  { %v402_v42 = vmul.f32 %v1497_v44, %v2368_v31  ;;  %v1628_v5 = vadd.f32 %v1564_v16, %v1433_v28  ;;  %v1240_v27 = vadd.f32 %v1176_v29, %v1046_v36  ;;  %v853_v30 = vadd.f32 %v789_v7, %v659_v3  ;;  %v2118_v18 = vld [vmem:[#allocation2] sm:$0xff]  ;;  %v1889_v36 = vld [vmem:[#allocation2 + $0x34a] sm:$0xff] }
 0x169   :  { %v2015_v62 = vadd.f32 %v1951_v2, %v1821_v58  ;;  %v1952_v11 = vmul.f32 %v2471_v34, %v1886_v21  ;;  %v1565_v46 = vmul.f32 %v2439_v19, %v1499_v49  ;;  %v1759_v23 = vmul.f32 %v3306_v38, %v1693_v0 }
 0x16a   :  { %v596_v20 = vmul.f32 %v1691_v33, %v2371_v32  ;;  %v1822_v26 = vadd.f32 %v1758_v25, %v1628_v5  ;;  %v1434_v12 = vadd.f32 %v1370_v54, %v1240_v27  ;;  %v1047_v61 = vadd.f32 %v983_v57, %v853_v30 }
 0x16b   :  { %2079 = vst [vmem:[#allocation8 + $0x1d0] sm:$0xff] %v2015_v62  ;;  %v1177_v10 = vmul.f32 %v1692_v24, %v3301_v40  ;;  %v1371_v44 = vmul.f32 %v1886_v21, %v2428_v63  ;;  %v790_v1 = vmul.f32 %v1885_v52, %v2387_v43  ;;  %v984_v59 = vmul.f32 %v1499_v49, %v2394_v48  ;;  %v1696_v49 = vld [vmem:[#allocation2 + $0x351] sm:$0xff] }
 0x16c   :  { %v660_v17 = vadd.f32 %v596_v20, %v402_v42  ;;  %v2016_v22 = vadd.f32 %v1952_v11, %v1822_v26  ;;  %v1629_v56 = vadd.f32 %v1565_v46, %v1434_v12  ;;  %v403_v33 = vmul.f32 %v1498_v35, %v2368_v31  ;;  %v1890_v62 = vld [vmem:[#allocation2 + $0x352] sm:$0xff] }
 0x16d   :  { %v1241_v45 = vadd.f32 %v1177_v10, %v1047_v61  ;;  %v1953_v41 = vmul.f32 %v2471_v34, %v1887_v9  ;;  %v597_v39 = vmul.f32 %v1692_v24, %v2371_v32  ;;  %v1566_v47 = vmul.f32 %v2439_v19, %v1500_v53 }
 0x16e   :  { %v854_v13 = vadd.f32 %v790_v1, %v660_v17  ;;  %2080 = vst [vmem:[#allocation8 + $0x1d8] sm:$0xff] %v2016_v22  ;;  %v1823_v15 = vadd.f32 %v1759_v23, %v1629_v56  ;;  %v1178_v52 = vmul.f32 %v1693_v0, %v3301_v40  ;;  %v791_v14 = vmul.f32 %v1886_v21, %v2387_v43 }
 0x16f   :  { %v1435_v4 = vadd.f32 %v1371_v44, %v1241_v45  ;;  %v661_v60 = vadd.f32 %v597_v39, %v403_v33  ;;  %v985_v31 = vmul.f32 %v1500_v53, %v2394_v48  ;;  %v1760_v6 = vmul.f32 %v3306_v38, %v1694_v37 }
 0x170   :  { %v1048_v50 = vadd.f32 %v984_v59, %v854_v13  ;;  %v2017_v35 = vadd.f32 %v1953_v41, %v1823_v15  ;;  %v1372_v24 = vmul.f32 %v1887_v9, %v2428_v63  ;;  %v1567_v2 = vmul.f32 %v2118_v18, %v2439_v19 }
 0x171   :  { %v1630_v8 = vadd.f32 %v1566_v47, %v1435_v4  ;;  %v855_v16 = vadd.f32 %v791_v14, %v661_v60  ;;  %v1954_v7 = vmul.f32 %v2471_v34, %v1888_v51  ;;  %v1761_v43 = vmul.f32 %v3306_v38, %v1695_v55 }
 0x172   :  { %v1242_v32 = vadd.f32 %v1178_v52, %v1048_v50  ;;  %2081 = vst [vmem:[#allocation8 + $0x1e0] sm:$0xff] %v2017_v35  ;;  %v1179_v28 = vmul.f32 %v1694_v37, %v3301_v40  ;;  %v1373_v25 = vmul.f32 %v1888_v51, %v2428_v63  ;;  %v1955_v54 = vmul.f32 %v2471_v34, %v1889_v36 }
 0x173   :  { %v1824_v29 = vadd.f32 %v1760_v6, %v1630_v8  ;;  %v1049_v48 = vadd.f32 %v985_v31, %v855_v16  ;;  %v1762_v42 = vmul.f32 %v3306_v38, %v1696_v49  ;;  %v1956_v30 = vmul.f32 %v2471_v34, %v1890_v62 }
 0x174   :  { %v1436_v58 = vadd.f32 %v1372_v24, %v1242_v32 }
 0x175   :  { %v2018_v21 = vadd.f32 %v1954_v7, %v1824_v29  ;;  %v1243_v3 = vadd.f32 %v1179_v28, %v1049_v48 }
 0x176   :  { %v1631_v0 = vadd.f32 %v1567_v2, %v1436_v58 }
 0x177   :  { %2082 = vst [vmem:[#allocation8 + $0x1e8] sm:$0xff] %v2018_v21  ;;  %v1437_v57 = vadd.f32 %v1373_v25, %v1243_v3 }
 0x178   :  { %v1825_v19 = vadd.f32 %v1761_v43, %v1631_v0 }
 0x179   :  { %v1632_v27 = vadd.f32 %v1567_v2, %v1437_v57 }
 0x17a   :  { %v2019_v5 = vadd.f32 %v1955_v54, %v1825_v19 }
 0x17b   :  { %v1826_v40 = vadd.f32 %v1762_v42, %v1632_v27 }
 0x17c   :  { %2083 = vst [vmem:[#allocation8 + $0x1f0] sm:$0xff] %v2019_v5 }
 0x17d   :  { %v2020_v11 = vadd.f32 %v1956_v30, %v1826_v40 }
 0x17f   :  { %2084 = vst [vmem:[#allocation8 + $0x1f8] sm:$0xff] %v2020_v11 }
 0x180   :  { %2158 = shalt.err (!%p2155_p9)
}
 0x181   :  { %2096 = dma.vmem_to_hbm [thread:$0]  %s2091_s27, 8192, %s3254_s2, [#allocation5], %s2175_s15, %s2175_s15, %s2176_s16  }
 0x182   :  { %2171 = dma.done.wait [#allocation5], 8192  }
 0x183   :  { %2172 = vsyncadd [#allocation5], 4294959104 }
 0x184   :  { %2100 = vsyncpa [#allocation4], 1 }
 0x185   :  { %2101 = vsyncpa [#allocation5], 1 }
 0x186   :  { %2102 = vsyncpa [#allocation6], 1 }

</bundles_post_ra>
